<compile_context>
chip_gen: v7x
topology: tpu7x:2x2x1
jax: 0.10.0
libtpu: 0.0.40
codegen_flags: <defaults>
</compile_context>

<pallas_src>
import functools
from types import SimpleNamespace

import jax
import jax.numpy as jnp
from jax import lax
from jax.experimental import pallas as pl
from jax.experimental.pallas import tpu as pltpu


def _round_up(x, m):
    return ((x + m - 1) // m) * m


# --------------------------------------------------------------------------- #
# In-kernel helper: one conv tap slice of a *value* (layers >= 1)
# --------------------------------------------------------------------------- #
def _tap_slice_val(v, dt, stride, t_out):
    # v: (B, T, C); returns v[:, dt::stride, :][:, :t_out, :]
    m, t_in, c = v.shape
    if stride == 1:
        return v[:, dt:dt + t_out, :]
    if dt + t_out * stride <= t_in:
        # contiguous slice + reshape keeps the load on the plain path
        return v[:, dt:dt + t_out * stride, :].reshape(m, t_out, stride, c)[:, :, 0, :]
    # TODO(synk): strided tail fallback goes through XLU permutes; pad T in the
    # wrapper at production shapes so this branch is never taken.
    return lax.slice(v, (0, dt, 0), (m, dt + (t_out - 1) * stride + 1, c),
                     (1, stride, 1))


# --------------------------------------------------------------------------- #
# Pallas kernel: one grid step == one word scored against ALL videos.
# --------------------------------------------------------------------------- #
def _scoring_kernel(video_ref, pooled_ref, *rest, k, stride, layers,
                    t_outs, slabs, cols):
    out_ref = rest[-1]                 # (1, B, total_pad) f32
    w1d_ref, b1d_ref = rest[-3], rest[-2]
    layer_refs = rest[:-3]             # per layer: Wconv (k*Cin,Cj) bf16,
                                       #            bconv (1,Cj) f32, Wword (Dw,Cj) bf16

    bsz = video_ref.shape[0]
    cj = w1d_ref.shape[-1]
    w1d = w1d_ref[...]                                    # (1, Cj)  f32
    b1d = b1d_ref[...]                                    # (1, 1)   f32
    pooled_i = pooled_ref[...].reshape(1, -1)             # (1, Dw)  bf16 (this word)

    def gate_for(word_w_ref):
        g = jnp.dot(pooled_i, word_w_ref[...], preferred_element_type=jnp.float32)
        return jax.nn.sigmoid(g)                          # (1, Cj) f32

    def head(v_f32, t_out, slab, col):
        # conv_1d(joint -> 1, kernel=1) + sigmoid, written as a lane-dense slab.
        v3 = v_f32.reshape(bsz, t_out, cj)
        logits = jnp.sum(v3 * w1d[None, :, :], axis=-1) + b1d     # (B, t_out) f32
        sig = jax.nn.sigmoid(logits)
        if slab > t_out:
            sig = jnp.concatenate(
                [sig, jnp.zeros((bsz, slab - t_out), jnp.float32)], axis=1)
        # col and slab are 128-multiples -> single unmasked dense store
        out_ref[:, :, col:col + slab] = sig[None]

    def conv_from_ref(src_ref, t_out, w_ref, b_ref):
        # im2col built from static ref slices (plain vld); one matmul for all taps.
        taps = []
        for dt in range(k):
            if stride == 1:
                taps.append(src_ref[:, dt:dt + t_out, :])
            else:
                taps.append(src_ref[:, pl.ds(dt, t_out, stride), :])
        cin = src_ref.shape[-1]
        op = jnp.concatenate(taps, axis=-1).reshape(bsz * t_out, k * cin)   # bf16
        acc = jnp.dot(op, w_ref[...], preferred_element_type=jnp.float32)
        return acc + b_ref[...]                                             # (B*t, Cj) f32

    def conv_from_val(v_bf, t_out, w_ref, b_ref):
        taps = [_tap_slice_val(v_bf, dt, stride, t_out) for dt in range(k)]
        cin = v_bf.shape[-1]
        op = jnp.concatenate(taps, axis=-1).reshape(bsz * t_out, k * cin)   # bf16
        acc = jnp.dot(op, w_ref[...], preferred_element_type=jnp.float32)
        return acc + b_ref[...]

    # ---- layer 0: conv directly from the (resident) bf16 video ref ----------
    t_out = t_outs[0]
    acc = conv_from_ref(video_ref, t_out, layer_refs[0], layer_refs[1])
    gate = gate_for(layer_refs[2])                        # (1, Cj) f32
    v = jnp.maximum(acc * gate, 0.0)                      # (B*t_out, Cj) f32
    head(v, t_out, slabs[0], cols[0])

    # ---- layers 1..L-1 -------------------------------------------------------
    for l in range(1, layers):
        v_bf = v.reshape(bsz, t_out, cj).astype(jnp.bfloat16)   # ONE bf16 cast / layer
        t_out = t_outs[l]
        acc = conv_from_val(v_bf, t_out, layer_refs[3 * l], layer_refs[3 * l + 1])
        gate = gate_for(layer_refs[3 * l + 2])
        v = jnp.maximum(acc * gate, 0.0)
        head(v, t_out, slabs[l], cols[l])


# --------------------------------------------------------------------------- #
# Parameter init (deterministic, synthetic, "logical" PyTorch-like shapes).
# --------------------------------------------------------------------------- #
def init_params(opt, word_dim, key):
    params = {"layers": []}
    cin = opt.video_dim
    for _ in range(opt.layers):
        key, k1, k2 = jax.random.split(key, 3)
        conv_w = jax.random.normal(k1, (opt.kernel_size, cin, opt.joint_dim),
                                   jnp.float32) / jnp.sqrt(opt.kernel_size * cin)
        conv_b = jnp.zeros((opt.joint_dim,), jnp.float32)
        word_w = jax.random.normal(k2, (word_dim, opt.joint_dim),
                                   jnp.float32) / jnp.sqrt(word_dim)
        params["layers"].append((conv_w, conv_b, word_w))
        cin = opt.joint_dim
    key, k3 = jax.random.split(key)
    params["conv1d_w"] = jax.random.normal(k3, (opt.joint_dim,),
                                           jnp.float32) / jnp.sqrt(opt.joint_dim)
    params["conv1d_b"] = jnp.zeros((), jnp.float32)
    return params


# --------------------------------------------------------------------------- #
# Wrapper == Criterion.forward
# --------------------------------------------------------------------------- #
def criterion_forward(params, opt, video, words, w_masks, lam):
    b, T, cv = video.shape
    _, L, dw = words.shape
    k, s, nl = opt.kernel_size, opt.stride, opt.layers

    # per-layer valid-conv output lengths + guard against degenerate configs
    t_outs = []
    t = T
    for l in range(nl):
        t = (t - k) // s + 1
        if t < 1:
            raise ValueError(f"layer {l}: t_out={t} < 1 (T={T}, k={k}, stride={s})")
        t_outs.append(t)
    total_t = sum(t_outs)

    # lane-dense per-layer output slabs (each a 128-multiple wide, 128-aligned)
    slabs = [_round_up(t_o, 128) for t_o in t_outs]
    cols = [0]
    for sl in slabs[:-1]:
        cols.append(cols[-1] + sl)
    total_pad = sum(slabs)

    # channel padding so MXU K/N dims are full 128-lane multiples
    cp = _round_up(cv, 128)
    cj = _round_up(opt.joint_dim, 128)
    dwp = _round_up(dw, 128)

    # hoisted masked-mean word pooling (exact: the per-layer projection is linear)
    denom = jnp.maximum(jnp.sum(w_masks, axis=-1, keepdims=True), 1.0)
    pooled = jnp.einsum('bl,bld->bd', w_masks, words) / denom              # (b, dw) f32
    pooled_p = jnp.pad(pooled, ((0, 0), (0, dwp - dw)))
    pooled_p = pooled_p.reshape(b, 1, dwp).astype(jnp.bfloat16)            # (b,1,Dw) bf16

    # video: zero-pad channels, bf16 MXU operand built once in the wrapper
    video_p = jnp.pad(video, ((0, 0), (0, 0), (0, cp - cv))).astype(jnp.bfloat16)

    # weights: zero-pad channels, fold the k conv taps (im2col weight), cast bf16 once
    flat_w = []
    cin_p, cin_raw = cp, cv
    for (cw, cb, ww) in params["layers"]:
        cw_p = jnp.pad(cw, ((0, 0), (0, cin_p - cin_raw), (0, cj - opt.joint_dim)))
        flat_w.append(cw_p.reshape(k * cin_p, cj).astype(jnp.bfloat16))    # (k*Cin, Cj)
        flat_w.append(jnp.pad(cb, (0, cj - opt.joint_dim)).reshape(1, cj)) # f32 bias
        flat_w.append(jnp.pad(ww, ((0, dwp - dw), (0, cj - opt.joint_dim))
                              ).astype(jnp.bfloat16))                      # (Dw, Cj)
        cin_p, cin_raw = cj, opt.joint_dim
    w1d_p = jnp.pad(params["conv1d_w"], (0, cj - opt.joint_dim)).reshape(1, cj)
    b1d_p = params["conv1d_b"].reshape(1, 1)

    # grid over the word index; weights/video pinned with constant index maps.
    # TODO(synk): at production shapes additionally tile the video batch B (second
    # "parallel" grid axis) and stream the video tile with pipeline_mode=pl.Buffered(3).
    in_specs = [
        pl.BlockSpec((b, T, cp), lambda i: (0, 0, 0)),      # video (resident)
        pl.BlockSpec((1, 1, dwp), lambda i: (i, 0, 0)),     # pooled word i
    ]
    kcin = k * cp
    for _ in range(nl):
        in_specs += [
            pl.BlockSpec((kcin, cj), lambda i: (0, 0)),
            pl.BlockSpec((1, cj), lambda i: (0, 0)),
            pl.BlockSpec((dwp, cj), lambda i: (0, 0)),
        ]
        kcin = k * cj
    in_specs += [
        pl.BlockSpec((1, cj), lambda i: (0, 0)),            # conv_1d weight
        pl.BlockSpec((1, 1), lambda i: (0, 0)),             # conv_1d bias
    ]
    out_spec = pl.BlockSpec((1, b, total_pad), lambda i: (i, 0, 0))

    # advisory cost estimate for the XLA scheduler
    conv_flops = sum(2 * b * t_o * (k * (cp if l == 0 else cj)) * cj
                     for l, t_o in enumerate(t_outs))
    gate_flops = nl * 2 * dwp * cj
    head_flops = sum(2 * b * t_o * cj for t_o in t_outs)
    flops = b * (conv_flops + gate_flops + head_flops)
    transcendentals = b * (nl * cj + b * total_t)
    bytes_accessed = (video_p.size * 2 + pooled_p.size * 2
                      + sum(int(w.size) * int(w.dtype.itemsize) for w in flat_w)
                      + w1d_p.size * 4 + b1d_p.size * 4
                      + b * b * total_pad * 4)

    kernel = functools.partial(
        _scoring_kernel, k=k, stride=s, layers=nl,
        t_outs=tuple(t_outs), slabs=tuple(slabs), cols=tuple(cols))

    scores_padded = pl.pallas_call(
        kernel,
        grid=(b,),                                          # one step per word
        in_specs=in_specs,
        out_specs=out_spec,
        out_shape=jax.ShapeDtypeStruct((b, b, total_pad), jnp.float32),
        compiler_params=pltpu.CompilerParams(
            dimension_semantics=("parallel",),              # words are independent
            vmem_limit_bytes=32 * 1024 * 1024),
        cost_estimate=pl.CostEstimate(
            flops=int(flops), transcendentals=int(transcendentals),
            bytes_accessed=int(bytes_accessed)),
    )(video_p, pooled_p, *flat_w, w1d_p, b1d_p)

    # strip lane padding; rows are (word i, video j)
    scores_full = jnp.concatenate(
        [scores_padded[:, :, cols[l]:cols[l] + t_outs[l]] for l in range(nl)],
        axis=-1)                                            # (b, b, total_t)

    # positive_map[i] = score of word i against its own video i
    positive_map = scores_full[jnp.arange(b), jnp.arange(b), :]

    # keep top int(total_t * (1 - lam)) temporal scores
    num_keep = max(int(total_t * (1.0 - lam)), 1)
    kept, _ = jax.lax.top_k(scores_full, num_keep)
    # TODO(synk): reference calls .diag() on a 3-D tensor (ill-defined in PyTorch);
    # we reduce the kept top-k scores with a mean to form the (B, B) similarity matrix.
    sim = jnp.mean(kept, axis=-1)

    # Bidirectional hinge loss in plain JAX (a (B,B) block in a dedicated
    # pallas_call would be pure launch/DMA overhead).
    margin = float(opt.global_margin)
    diag = jnp.diagonal(sim)
    eye = jnp.eye(b, dtype=bool)
    cost_s = jnp.where(eye, 0.0, jnp.maximum(margin + sim - diag[:, None], 0.0))
    cost_im = jnp.where(eye, 0.0, jnp.maximum(margin + sim - diag[None, :], 0.0))
    loss = (jnp.sum(cost_s) + jnp.sum(cost_im)) / b

    # TODO(synk): opt.max_violation hard-negative top-k branch and TensorBoard
    # writer side effects are not implemented (max_violation=False here).
    return loss, positive_map


if __name__ == "__main__":
    opt = SimpleNamespace(
        video_dim=32, joint_dim=32, kernel_size=3, layers=2, stride=1,
        global_margin=0.2, max_violation=False, neg_num=2, log_step=10)
    b, T, L, word_dim = 4, 16, 8, 32
    lam = 0.5

    key = jax.random.PRNGKey(0)
    kv, kw, kp = jax.random.split(key, 3)
    video = jax.random.normal(kv, (b, T, opt.video_dim), jnp.float32)
    words = jax.random.normal(kw, (b, L, word_dim), jnp.float32)
    lengths = jnp.array([8, 6, 5, 7])
    w_masks = (jnp.arange(L)[None, :] < lengths[:, None]).astype(jnp.float32)

    params = init_params(opt, word_dim, kp)

    loss, positive_map = criterion_forward(params, opt, video, words, w_masks, lam)
    loss = jax.block_until_ready(loss)
    positive_map = jax.block_until_ready(positive_map)

    expected_t = (T - opt.kernel_size) // opt.stride + 1
    expected_t = expected_t + ((expected_t - opt.kernel_size) // opt.stride + 1)
    assert positive_map.shape == (b, expected_t)
    assert bool(jnp.all(jnp.isfinite(positive_map)))
    assert bool(jnp.isfinite(loss))
    print("KERNEL_OK")
</pallas_src>

<mosaic_0001>
module attributes {stable_mosaic.version = 11 : i64} {
  func.func @_scoring_kernel(%arg0: i32, %arg1: memref<4x16x128xbf16, #tpu.memory_space<vmem>>, %arg2: memref<1x1x128xbf16, #tpu.memory_space<vmem>>, %arg3: memref<384x128xbf16, #tpu.memory_space<vmem>>, %arg4: memref<1x128xf32, #tpu.memory_space<vmem>>, %arg5: memref<128x128xbf16, #tpu.memory_space<vmem>>, %arg6: memref<384x128xbf16, #tpu.memory_space<vmem>>, %arg7: memref<1x128xf32, #tpu.memory_space<vmem>>, %arg8: memref<128x128xbf16, #tpu.memory_space<vmem>>, %arg9: memref<1x128xf32, #tpu.memory_space<vmem>>, %arg10: memref<1x1xf32, #tpu.memory_space<vmem>>, %arg11: memref<1x4x256xf32, #tpu.memory_space<vmem>>) attributes {dimension_semantics = [#tpu.dimension_semantics<parallel>], iteration_bounds = array<i64: 4>, scalar_prefetch = 0 : i64, scratch_operands = 0 : i64, tpu.core_type = #tpu.core_type<tc>, window_params = [{pipeline_mode = #tpu.pipeline_mode<synchronous>, transform_indices = @transform_0, window_bounds = array<i64: 4, 16, 128>}, {transform_indices = @transform_1, window_bounds = array<i64: 1, 1, 128>}, {pipeline_mode = #tpu.pipeline_mode<synchronous>, transform_indices = @transform_2, window_bounds = array<i64: 384, 128>}, {pipeline_mode = #tpu.pipeline_mode<synchronous>, transform_indices = @transform_3, window_bounds = array<i64: 1, 128>}, {pipeline_mode = #tpu.pipeline_mode<synchronous>, transform_indices = @transform_4, window_bounds = array<i64: 128, 128>}, {pipeline_mode = #tpu.pipeline_mode<synchronous>, transform_indices = @transform_5, window_bounds = array<i64: 384, 128>}, {pipeline_mode = #tpu.pipeline_mode<synchronous>, transform_indices = @transform_6, window_bounds = array<i64: 1, 128>}, {pipeline_mode = #tpu.pipeline_mode<synchronous>, transform_indices = @transform_7, window_bounds = array<i64: 128, 128>}, {pipeline_mode = #tpu.pipeline_mode<synchronous>, transform_indices = @transform_8, window_bounds = array<i64: 1, 128>}, {pipeline_mode = #tpu.pipeline_mode<synchronous>, transform_indices = @transform_9, window_bounds = array<i64: 1, 1>}, {transform_indices = @transform_10, window_bounds = array<i64: 1, 4, 256>}]} {
    %c0 = arith.constant 0 : index
    %c0_0 = arith.constant 0 : index
    %0 = vector.load %arg9[%c0, %c0_0] : memref<1x128xf32, #tpu.memory_space<vmem>>, vector<1x128xf32>
    %c0_1 = arith.constant 0 : index
    %c0_2 = arith.constant 0 : index
    %1 = vector.load %arg10[%c0_1, %c0_2] : memref<1x1xf32, #tpu.memory_space<vmem>>, vector<1x1xf32>
    %c0_3 = arith.constant 0 : index
    %c0_4 = arith.constant 0 : index
    %c0_5 = arith.constant 0 : index
    %2 = vector.load %arg2[%c0_3, %c0_4, %c0_5] : memref<1x1x128xbf16, #tpu.memory_space<vmem>>, vector<1x1x128xbf16>
    %3 = vector.shape_cast %2 : vector<1x1x128xbf16> to vector<1x128xbf16>
    %c0_6 = arith.constant 0 : index
    %c0_7 = arith.constant 0 : index
    %c0_8 = arith.constant 0 : index
    %4 = vector.load %arg1[%c0_6, %c0_7, %c0_8] : memref<4x16x128xbf16, #tpu.memory_space<vmem>>, vector<4x14x128xbf16>
    %c0_9 = arith.constant 0 : index
    %c1 = arith.constant 1 : index
    %c0_10 = arith.constant 0 : index
    %5 = vector.load %arg1[%c0_9, %c1, %c0_10] : memref<4x16x128xbf16, #tpu.memory_space<vmem>>, vector<4x14x128xbf16>
    %c0_11 = arith.constant 0 : index
    %c2 = arith.constant 2 : index
    %c0_12 = arith.constant 0 : index
    %6 = vector.load %arg1[%c0_11, %c2, %c0_12] : memref<4x16x128xbf16, #tpu.memory_space<vmem>>, vector<4x14x128xbf16>
    %7 = tpu.concatenate %4, %5, %6 in 2 : vector<4x14x128xbf16>, vector<4x14x128xbf16>, vector<4x14x128xbf16> -> vector<4x14x384xbf16>
    %8 = vector.shape_cast %7 : vector<4x14x384xbf16> to vector<56x384xbf16>
    %c0_13 = arith.constant 0 : index
    %c0_14 = arith.constant 0 : index
    %9 = vector.load %arg3[%c0_13, %c0_14] : memref<384x128xbf16, #tpu.memory_space<vmem>>, vector<384x128xbf16>
    %cst = arith.constant dense<0.000000e+00> : vector<56x128xf32>
    %10 = tpu.matmul %8, %9, %cst {dimension_numbers = #tpu.dot_dimension_numbers<[1], [0], [0], [1], [0, 0, 1, 1], [], []>} : vector<56x384xbf16>, vector<384x128xbf16>, vector<56x128xf32> -> vector<56x128xf32>
    %c0_15 = arith.constant 0 : index
    %c0_16 = arith.constant 0 : index
    %11 = vector.load %arg4[%c0_15, %c0_16] : memref<1x128xf32, #tpu.memory_space<vmem>>, vector<1x128xf32>
    %12 = vector.broadcast %11 : vector<1x128xf32> to vector<56x128xf32>
    %13 = arith.addf %10, %12 : vector<56x128xf32>
    %c0_17 = arith.constant 0 : index
    %c0_18 = arith.constant 0 : index
    %14 = vector.load %arg5[%c0_17, %c0_18] : memref<128x128xbf16, #tpu.memory_space<vmem>>, vector<128x128xbf16>
    %cst_19 = arith.constant dense<0.000000e+00> : vector<1x128xf32>
    %15 = tpu.matmul %3, %14, %cst_19 {dimension_numbers = #tpu.dot_dimension_numbers<[1], [0], [0], [1], [0, 0, 1, 1], [], []>} : vector<1x128xbf16>, vector<128x128xbf16>, vector<1x128xf32> -> vector<1x128xf32>
    %16 = arith.negf %15 : vector<1x128xf32>
    %17 = math.exp %16 : vector<1x128xf32>
    %cst_20 = arith.constant 1.000000e+00 : f32
    %18 = vector.broadcast %cst_20 : f32 to vector<1x128xf32>
    %19 = arith.addf %18, %17 : vector<1x128xf32>
    %20 = arith.divf %18, %19 : vector<1x128xf32>
    %21 = vector.broadcast %20 : vector<1x128xf32> to vector<56x128xf32>
    %22 = arith.mulf %13, %21 : vector<56x128xf32>
    %cst_21 = arith.constant 0.000000e+00 : f32
    %23 = vector.broadcast %cst_21 : f32 to vector<56x128xf32>
    %24 = arith.maximumf %22, %23 : vector<56x128xf32>
    %25 = vector.shape_cast %24 : vector<56x128xf32> to vector<4x14x128xf32>
    %26 = vector.shape_cast %0 : vector<1x128xf32> to vector<1x1x128xf32>
    %27 = vector.broadcast %26 : vector<1x1x128xf32> to vector<4x14x128xf32>
    %28 = arith.mulf %25, %27 : vector<4x14x128xf32>
    %cst_22 = arith.constant dense<0.000000e+00> : vector<4x14xf32>
    %29 = vector.multi_reduction <add>, %28, %cst_22 [2] : vector<4x14x128xf32> to vector<4x14xf32>
    %30 = vector.broadcast %1 : vector<1x1xf32> to vector<4x14xf32>
    %31 = arith.addf %29, %30 : vector<4x14xf32>
    %32 = arith.negf %31 : vector<4x14xf32>
    %33 = math.exp %32 : vector<4x14xf32>
    %cst_23 = arith.constant 1.000000e+00 : f32
    %34 = vector.broadcast %cst_23 : f32 to vector<4x14xf32>
    %35 = arith.addf %34, %33 : vector<4x14xf32>
    %36 = arith.divf %34, %35 : vector<4x14xf32>
    %cst_24 = arith.constant 0.000000e+00 : f32
    %37 = vector.broadcast %cst_24 : f32 to vector<4x114xf32>
    %38 = tpu.concatenate %36, %37 in 1 : vector<4x14xf32>, vector<4x114xf32> -> vector<4x128xf32>
    %39 = vector.shape_cast %38 : vector<4x128xf32> to vector<1x4x128xf32>
    %c0_25 = arith.constant 0 : index
    %c0_26 = arith.constant 0 : index
    %c0_27 = arith.constant 0 : index
    %40 = vector.load %arg11[%c0_25, %c0_26, %c0_27] : memref<1x4x256xf32, #tpu.memory_space<vmem>>, vector<1x4x128xf32>
    tpu.vector_store %arg11[%c0_25, %c0_26, %c0_27], %39 {strides = array<i32>} : memref<1x4x256xf32, #tpu.memory_space<vmem>>, vector<1x4x128xf32>,
    %41 = vector.shape_cast %24 : vector<56x128xf32> to vector<4x14x128xf32>
    %42 = arith.truncf %41 : vector<4x14x128xf32> to vector<4x14x128xbf16>
    %43 = vector.extract_strided_slice %42 {offsets = [0, 0, 0], sizes = [4, 12, 128], strides = [1, 1, 1]} : vector<4x14x128xbf16> to vector<4x12x128xbf16>
    %44 = vector.extract_strided_slice %42 {offsets = [0, 1, 0], sizes = [4, 12, 128], strides = [1, 1, 1]} : vector<4x14x128xbf16> to vector<4x12x128xbf16>
    %45 = vector.extract_strided_slice %42 {offsets = [0, 2, 0], sizes = [4, 12, 128], strides = [1, 1, 1]} : vector<4x14x128xbf16> to vector<4x12x128xbf16>
    %46 = tpu.concatenate %43, %44, %45 in 2 : vector<4x12x128xbf16>, vector<4x12x128xbf16>, vector<4x12x128xbf16> -> vector<4x12x384xbf16>
    %47 = vector.shape_cast %46 : vector<4x12x384xbf16> to vector<48x384xbf16>
    %c0_28 = arith.constant 0 : index
    %c0_29 = arith.constant 0 : index
    %48 = vector.load %arg6[%c0_28, %c0_29] : memref<384x128xbf16, #tpu.memory_space<vmem>>, vector<384x128xbf16>
    %cst_30 = arith.constant dense<0.000000e+00> : vector<48x128xf32>
    %49 = tpu.matmul %47, %48, %cst_30 {dimension_numbers = #tpu.dot_dimension_numbers<[1], [0], [0], [1], [0, 0, 1, 1], [], []>} : vector<48x384xbf16>, vector<384x128xbf16>, vector<48x128xf32> -> vector<48x128xf32>
    %c0_31 = arith.constant 0 : index
    %c0_32 = arith.constant 0 : index
    %50 = vector.load %arg7[%c0_31, %c0_32] : memref<1x128xf32, #tpu.memory_space<vmem>>, vector<1x128xf32>
    %51 = vector.broadcast %50 : vector<1x128xf32> to vector<48x128xf32>
    %52 = arith.addf %49, %51 : vector<48x128xf32>
    %c0_33 = arith.constant 0 : index
    %c0_34 = arith.constant 0 : index
    %53 = vector.load %arg8[%c0_33, %c0_34] : memref<128x128xbf16, #tpu.memory_space<vmem>>, vector<128x128xbf16>
    %cst_35 = arith.constant dense<0.000000e+00> : vector<1x128xf32>
    %54 = tpu.matmul %3, %53, %cst_35 {dimension_numbers = #tpu.dot_dimension_numbers<[1], [0], [0], [1], [0, 0, 1, 1], [], []>} : vector<1x128xbf16>, vector<128x128xbf16>, vector<1x128xf32> -> vector<1x128xf32>
    %55 = arith.negf %54 : vector<1x128xf32>
    %56 = math.exp %55 : vector<1x128xf32>
    %cst_36 = arith.constant 1.000000e+00 : f32
    %57 = vector.broadcast %cst_36 : f32 to vector<1x128xf32>
    %58 = arith.addf %57, %56 : vector<1x128xf32>
    %59 = arith.divf %57, %58 : vector<1x128xf32>
    %60 = vector.broadcast %59 : vector<1x128xf32> to vector<48x128xf32>
    %61 = arith.mulf %52, %60 : vector<48x128xf32>
    %cst_37 = arith.constant 0.000000e+00 : f32
    %62 = vector.broadcast %cst_37 : f32 to vector<48x128xf32>
    %63 = arith.maximumf %61, %62 : vector<48x128xf32>
    %64 = vector.shape_cast %63 : vector<48x128xf32> to vector<4x12x128xf32>
    %65 = vector.shape_cast %0 : vector<1x128xf32> to vector<1x1x128xf32>
    %66 = vector.broadcast %65 : vector<1x1x128xf32> to vector<4x12x128xf32>
    %67 = arith.mulf %64, %66 : vector<4x12x128xf32>
    %cst_38 = arith.constant dense<0.000000e+00> : vector<4x12xf32>
    %68 = vector.multi_reduction <add>, %67, %cst_38 [2] : vector<4x12x128xf32> to vector<4x12xf32>
    %69 = vector.broadcast %1 : vector<1x1xf32> to vector<4x12xf32>
    %70 = arith.addf %68, %69 : vector<4x12xf32>
    %71 = arith.negf %70 : vector<4x12xf32>
    %72 = math.exp %71 : vector<4x12xf32>
    %cst_39 = arith.constant 1.000000e+00 : f32
    %73 = vector.broadcast %cst_39 : f32 to vector<4x12xf32>
    %74 = arith.addf %73, %72 : vector<4x12xf32>
    %75 = arith.divf %73, %74 : vector<4x12xf32>
    %cst_40 = arith.constant 0.000000e+00 : f32
    %76 = vector.broadcast %cst_40 : f32 to vector<4x116xf32>
    %77 = tpu.concatenate %75, %76 in 1 : vector<4x12xf32>, vector<4x116xf32> -> vector<4x128xf32>
    %78 = vector.shape_cast %77 : vector<4x128xf32> to vector<1x4x128xf32>
    %c0_41 = arith.constant 0 : index
    %c0_42 = arith.constant 0 : index
    %c128 = arith.constant 128 : index
    %79 = vector.load %arg11[%c0_41, %c0_42, %c128] : memref<1x4x256xf32, #tpu.memory_space<vmem>>, vector<1x4x128xf32>
    tpu.vector_store %arg11[%c0_41, %c0_42, %c128], %78 {strides = array<i32>} : memref<1x4x256xf32, #tpu.memory_space<vmem>>, vector<1x4x128xf32>,
    return
  }
  func.func @transform_0(%arg0: i32) -> (i32, i32, i32) {
    %c0_i32 = arith.constant 0 : i32
    %c0_i32_0 = arith.constant 0 : i32
    %c0_i32_1 = arith.constant 0 : i32
    %c0_i32_2 = arith.constant 0 : i32
    return %c0_i32, %c0_i32_0, %c0_i32_1 : i32, i32, i32
  }
  func.func @transform_1(%arg0: i32) -> (i32, i32, i32) {
    %c0_i32 = arith.constant 0 : i32
    %c0_i32_0 = arith.constant 0 : i32
    %c0_i32_1 = arith.constant 0 : i32
    return %arg0, %c0_i32, %c0_i32_0 : i32, i32, i32
  }
  func.func @transform_2(%arg0: i32) -> (i32, i32) {
    %c0_i32 = arith.constant 0 : i32
    %c0_i32_0 = arith.constant 0 : i32
    %c0_i32_1 = arith.constant 0 : i32
    return %c0_i32, %c0_i32_0 : i32, i32
  }
  func.func @transform_3(%arg0: i32) -> (i32, i32) {
    %c0_i32 = arith.constant 0 : i32
    %c0_i32_0 = arith.constant 0 : i32
    %c0_i32_1 = arith.constant 0 : i32
    return %c0_i32, %c0_i32_0 : i32, i32
  }
  func.func @transform_4(%arg0: i32) -> (i32, i32) {
    %c0_i32 = arith.constant 0 : i32
    %c0_i32_0 = arith.constant 0 : i32
    %c0_i32_1 = arith.constant 0 : i32
    return %c0_i32, %c0_i32_0 : i32, i32
  }
  func.func @transform_5(%arg0: i32) -> (i32, i32) {
    %c0_i32 = arith.constant 0 : i32
    %c0_i32_0 = arith.constant 0 : i32
    %c0_i32_1 = arith.constant 0 : i32
    return %c0_i32, %c0_i32_0 : i32, i32
  }
  func.func @transform_6(%arg0: i32) -> (i32, i32) {
    %c0_i32 = arith.constant 0 : i32
    %c0_i32_0 = arith.constant 0 : i32
    %c0_i32_1 = arith.constant 0 : i32
    return %c0_i32, %c0_i32_0 : i32, i32
  }
  func.func @transform_7(%arg0: i32) -> (i32, i32) {
    %c0_i32 = arith.constant 0 : i32
    %c0_i32_0 = arith.constant 0 : i32
    %c0_i32_1 = arith.constant 0 : i32
    return %c0_i32, %c0_i32_0 : i32, i32
  }
  func.func @transform_8(%arg0: i32) -> (i32, i32) {
    %c0_i32 = arith.constant 0 : i32
    %c0_i32_0 = arith.constant 0 : i32
    %c0_i32_1 = arith.constant 0 : i32
    return %c0_i32, %c0_i32_0 : i32, i32
  }
  func.func @transform_9(%arg0: i32) -> (i32, i32) {
    %c0_i32 = arith.constant 0 : i32
    %c0_i32_0 = arith.constant 0 : i32
    %c0_i32_1 = arith.constant 0 : i32
    return %c0_i32, %c0_i32_0 : i32, i32
  }
  func.func @transform_10(%arg0: i32) -> (i32, i32, i32) {
    %c0_i32 = arith.constant 0 : i32
    %c0_i32_0 = arith.constant 0 : i32
    %c0_i32_1 = arith.constant 0 : i32
    return %arg0, %c0_i32, %c0_i32_0 : i32, i32, i32
  }
}

</mosaic_0001>

<bundles_post_ra>
// kernel: tpu_custom_call.1
= control target key start
LH: loop header
LB: loop body
LE: loop exit
PB: predicated region body
PF: predicated region fallthrough
CT: control target
= control target key end

     0   :  { %s4680_s0 = inlined_call_operand.hbm [shape: bf16[4,16,128], index: 0, kind: input, shape index: {}]   ;;  %s4681_s1 = inlined_call_operand.vmem [shape: bf16[4,1,128], index: 1, kind: input, shape index: {}]   ;;  %s4682_s2 = inlined_call_operand.hbm [shape: bf16[384,128], index: 2, kind: input, shape index: {}]   ;;  %s4683_s3 = inlined_call_operand.vmem [shape: f32[1,128], index: 3, kind: input, shape index: {}]   ;;  %s4684_s4 = inlined_call_operand.hbm [shape: bf16[128,128], index: 4, kind: input, shape index: {}]   ;;  %s4685_s5 = inlined_call_operand.hbm [shape: bf16[384,128], index: 5, kind: input, shape index: {}]   ;;  %s4686_s6 = inlined_call_operand.vmem [shape: f32[1,128], index: 6, kind: input, shape index: {}]   ;;  %s4687_s7 = inlined_call_operand.hbm [shape: bf16[128,128], index: 7, kind: input, shape index: {}]   ;;  %s4688_s8 = inlined_call_operand.vmem [shape: f32[1,128], index: 8, kind: input, shape index: {}]   ;;  %s4689_s9 = inlined_call_operand.<no memory space> [shape: f32[1,1], index: 9, kind: input, shape index: {}]   ;;  %s4690_s10 = inlined_call_operand.hbm [shape: f32[4,4,256], index: 10, kind: output, shape index: {}]  }
   0x1   :  { %4699 = sst [smem:[#allocation22_spill]] %s4682_s2  ;;  %v15_v0 = vstv %s4689_s9 }
   0x2   :  { %16 = vst [vmem:[#allocation2] sm:$0x1] %v15_v0 }
   0x3   :  { %17 = vsyncpa [#allocation4], 0 }
   0x4   :  { %18 = vsyncpa [#allocation7], 0 }
   0x5   :  { %19 = vsyncpa [#allocation10], 0 }
   0x6   :  { %20 = vsyncpa [#allocation5], 0 }
   0x7   :  { %22 = vsyncpa [#allocation5 + $0x1], 0  ;;  %s4047_s15 = smov 0   ;;  %s4049_s16 = smov 0  }
   0x8   :  { %s4051_s17 = smov 0   ;;  %s4053_s18 = smov 0  }
   0x9 LB: > { %4700 = sst [smem:[#allocation17_spill]] %s3962_s15  ;;  %s4068_s9 = sadd.s32 4294967295, %s3974_s18   ;;  %s3974_s18 = sphi %s4053_s18, %s4722_s18   ;;  %s3970_s17 = sphi %s4051_s17, %s4724_s17   ;;  %s3966_s16 = sphi %s4049_s16, %s4726_s16   ;;  %s3962_s15 = sphi %s4047_s15, %s4725_s15  }
   0xa   : > { %4701 = sst [smem:[#allocation18_spill]] %s3970_s17  ;;  %s3174_s19 = sadd.s32 4294967294, %s3974_s18  }
   0xb   : > { %s4072_s20 = sadd.s32 1, %s3974_s18   ;;  %s250_s21 = sadd.s32 1, %s3970_s17 }
   0xc   : > { %4702 = sst [smem:[#allocation19_spill]] %s4072_s20  ;;  %s247_s22 = ssub.s32 %s3974_s18, %s4072_s20 }
   0xd   : > { %p260_p0 = scmp.ne.s32.totalorder %s3970_s17, %s3966_s16  ;;  %p248_p1 = scmp.eq.s32.totalorder %s247_s22, 0 }
   0xe   : > { %p261_p2 = scmp.eq.s32.totalorder %s4068_s9, 3  ;;  %p266_p3 = scmp.ne.s32.totalorder %s3966_s16, %s3962_s15 }
   0xf   : > { %p267_p4 = scmp.eq.s32.totalorder %s3174_s19, 3  ;;  %p3175_p7 = scmp.ge.s32.totalorder %s3974_s18, 1 }
  0x10   : > { %s4083_s23 = scalar_select %p248_p1, %s3970_s17, %s250_s21  }
  0x11   : > { %p4085_p5 = por %p261_p2, %p260_p0  ;;  %p4089_p6 = por %p267_p4, %p266_p3 }
  0x12   : > { %4703 = sst [smem:[#allocation20_spill]] %s4083_s23  ;;  %p274_p8 = scmp.lt.s32.totalorder %s3974_s18, 5 }
  0x13   : > { %s4704_s24 = scalar_select %p4085_p5, 1, 0 }
  0x14   : > { %s4705_s25 = scalar_select %p4089_p6, 1, 0 }
  0x15   : > { %p4691_p9 = scmp.eq.s32.totalorder %s4068_s9, 0  ;;  %p4096_p10 = pnand %p3175_p7, %p274_p8 }
  0x16   : > { %4706 = sst [smem:[#allocation21_spill]] %s4705_s25  ;;  %s3976_s27 = smov [#allocation6]  }
  0x17   : > { %s4707_s26 = scalar_select %p4096_p10, 1, 0 }
  0x18   : > { %p3536_p11 = pneg %p4096_p10  ;;  %s299_s28 = sshll.u32 %s3976_s27, 4  ;;  %s4102_s28 = int_to_ptr.vmem [resolvable:$true] %s299_s28 }
  0x19   : > { %s3977_s30 = smov [#allocation9]   ;;  %s3978_s12 = smov [#allocation3]  }
  0x1a   : > { %p4106_p12 = pnand %p4691_p9, %p3536_p11  ;;  %s328_s11 = sshll.u32 %s3977_s30, 4  ;;  %s4110_s11 = int_to_ptr.vmem [resolvable:$true] %s328_s11 }
  0x1b   : > { %s4112_s13 = sshll.u32 %s3978_s12, 4  ;;  %s4709_s2 = sld [smem:[#allocation22_spill]]  ;;  %s287_s13 = int_to_ptr.vmem [resolvable:$true] %s4112_s13 }
  0x1c   : > { %p4122_p0 = pneg %p4106_p12 }
  0x21   : > { %s3760_s21 = scalar_lea.hbm %s4709_s2, 3072 }
  0x22   : > { %p3761_p13 = scmp.ne.s32.totalorder %s4709_s2, %s3760_s21  ;;  %p3767_p3 = scmp.lt.u32.totalorder %s3760_s21, %s4709_s2 }
  0x24   : > { %p3763_p1 = pnand %p4122_p0, %p3761_p13 }
  0x26   : > { %p3764_p2 = pneg %p3763_p1 }
  0x28   : > { %p3769_p4 = pnand %p3767_p3, %p3764_p2 }
  0x2a   : > { %3772 = shalt.err (!%p3769_p4)
}
  0x2b   : > { %s3773_s14 = scalar_lea.vmem %s4102_s28, 3072  ;;  %p3781_p9 = scmp.lt.s32.totalorder %s4102_s28, %s4102_s28 }
  0x2c   : > { %p3774_p7 = scmp.ne.s32.totalorder %s4102_s28, %s3773_s14  ;;  %p3782_p6 = scmp.lt.s32.totalorder %s3773_s14, %s3773_s14 }
  0x2e   : > { %p3776_p8 = pnand %p3774_p7, %p4122_p0  ;;  %p3783_p13 = por %p3782_p6, %p3781_p9 }
  0x30   : > { %p3777_p11 = pneg %p3776_p8 }
  0x32   : > { %p3784_p1 = pnand %p3783_p13, %p3777_p11 }
  0x34   : > { %3787 = shalt.err (!%p3784_p1)
}
  0x35   : > { %s3979_s19 = smov 64   ;;  %s3980_s21 = smov 4  }
  0x36   : > { %3542 = dma.hbm_to_vmem [thread:$0]  (!%p4106_p12), %s4709_s2, 3072, %s4102_s28, [#allocation7], %s3979_s19, %s3979_s19, %s3980_s21  }
  0x37   : > { %s3788_s14 = scalar_lea.hbm %s4685_s5, 3072 }
  0x38   : > { %p3789_p6 = scmp.ne.s32.totalorder %s4685_s5, %s3788_s14  ;;  %p3795_p3 = scmp.lt.u32.totalorder %s3788_s14, %s4685_s5 }
  0x3a   : > { %p3791_p9 = pnand %p3789_p6, %p4122_p0 }
  0x3c   : > { %p3792_p2 = pneg %p3791_p9 }
  0x3e   : > { %p3797_p4 = pnand %p3795_p3, %p3792_p2 }
  0x40   : > { %3800 = shalt.err (!%p3797_p4)
}
  0x41   : > { %s3801_s28 = scalar_lea.vmem %s4110_s11, 3072  ;;  %p3809_p13 = scmp.lt.s32.totalorder %s4110_s11, %s4110_s11 }
  0x42   : > { %p3802_p7 = scmp.ne.s32.totalorder %s4110_s11, %s3801_s28  ;;  %p3810_p1 = scmp.lt.s32.totalorder %s3801_s28, %s3801_s28 }
  0x44   : > { %p3804_p8 = pnand %p3802_p7, %p4122_p0  ;;  %p3811_p6 = por %p3810_p1, %p3809_p13 }
  0x46   : > { %p3805_p11 = pneg %p3804_p8 }
  0x48   : > { %p3812_p9 = pnand %p3811_p6, %p3805_p11 }
  0x4a   : > { %3815 = shalt.err (!%p3812_p9)
}
  0x4b   : > { %3548 = dma.hbm_to_vmem [thread:$0]  (!%p4106_p12), %s4685_s5, 3072, %s4110_s11, [#allocation10], %s3979_s19, %s3979_s19, %s3980_s21  }
  0x4c   : > { %s3816_s22 = scalar_lea.hbm %s4680_s0, 512 }
  0x4d   : > { %p3817_p2 = scmp.ne.s32.totalorder %s4680_s0, %s3816_s22  ;;  %p3823_p7 = scmp.lt.u32.totalorder %s3816_s22, %s4680_s0 }
  0x4f   : > { %p3819_p3 = pnand %p3817_p2, %p4122_p0 }
  0x51   : > { %p3820_p4 = pneg %p3819_p3 }
  0x53   : > { %p3825_p8 = pnand %p3823_p7, %p3820_p4 }
  0x55   : > { %3828 = shalt.err (!%p3825_p8)
}
  0x56   : > { %s3829_s28 = scalar_lea.vmem %s287_s13, 512  ;;  %p3837_p6 = scmp.lt.s32.totalorder %s287_s13, %s287_s13 }
  0x57   : > { %p3830_p11 = scmp.ne.s32.totalorder %s287_s13, %s3829_s28  ;;  %p3838_p9 = scmp.lt.s32.totalorder %s3829_s28, %s3829_s28 }
  0x59   : > { %p3832_p13 = pnand %p3830_p11, %p4122_p0  ;;  %p3839_p5 = por %p3838_p9, %p3837_p6 }
  0x5b   : > { %p3833_p1 = pneg %p3832_p13 }
  0x5d   : > { %p3840_p10 = pnand %p3839_p5, %p3833_p1 }
  0x5f   : > { %3843 = shalt.err (!%p3840_p10)
}
  0x60   : > { %3539 = dma.hbm_to_vmem [thread:$0]  (!%p4106_p12), %s4680_s0, 512, %s287_s13, [#allocation4], %s3979_s19, %s3979_s19, %s3980_s21  }
  0x61   : > { %s3981_s17 = smov [#allocation8]   ;;  %s3982_s25 = smov [#allocation11]  }
  0x62   : > { %s315_s20 = sshll.u32 %s3981_s17, 4  ;;  %s344_s22 = sshll.u32 %s3982_s25, 4  ;;  %s316_s20 = int_to_ptr.vmem [resolvable:$true] %s315_s20  ;;  %s345_s22 = int_to_ptr.vmem [resolvable:$true] %s344_s22 }
  0x63   : > { %s3844_s12 = scalar_lea.hbm %s4684_s4, 1024 }
  0x64   : > { %p3845_p5 = scmp.ne.s32.totalorder %s4684_s4, %s3844_s12  ;;  %p3851_p3 = scmp.lt.u32.totalorder %s3844_s12, %s4684_s4 }
  0x66   : > { %p3847_p10 = pnand %p3845_p5, %p4122_p0 }
  0x68   : > { %p3848_p2 = pneg %p3847_p10 }
  0x6a   : > { %p3853_p4 = pnand %p3851_p3, %p3848_p2 }
  0x6c   : > { %3856 = shalt.err (!%p3853_p4)
}
  0x6d   : > { %s3857_s13 = scalar_lea.vmem %s316_s20, 1024  ;;  %p3865_p13 = scmp.lt.s32.totalorder %s316_s20, %s316_s20 }
  0x6e   : > { %p3858_p7 = scmp.ne.s32.totalorder %s316_s20, %s3857_s13  ;;  %p3866_p1 = scmp.lt.s32.totalorder %s3857_s13, %s3857_s13 }
  0x70   : > { %p3860_p8 = pnand %p3858_p7, %p4122_p0  ;;  %p3867_p6 = por %p3866_p1, %p3865_p13 }
  0x72   : > { %p3861_p11 = pneg %p3860_p8 }
  0x74   : > { %p3868_p9 = pnand %p3867_p6, %p3861_p11 }
  0x76   : > { %3871 = shalt.err (!%p3868_p9)
}
  0x77   : > { %3545 = dma.hbm_to_vmem [thread:$0]  (!%p4106_p12), %s4684_s4, 1024, %s316_s20, [#allocation7], %s3979_s19, %s3979_s19, %s3980_s21  }
  0x78   : > { %s3872_s27 = scalar_lea.hbm %s4687_s7, 1024 }
  0x79   : > { %p3873_p5 = scmp.ne.s32.totalorder %s4687_s7, %s3872_s27  ;;  %p3879_p3 = scmp.lt.u32.totalorder %s3872_s27, %s4687_s7 }
  0x7b   : > { %p3875_p10 = pnand %p3873_p5, %p4122_p0 }
  0x7d   : > { %p3876_p2 = pneg %p3875_p10 }
  0x7f   : > { %p3881_p4 = pnand %p3879_p3, %p3876_p2 }
  0x81   : > { %3884 = shalt.err (!%p3881_p4)
}
  0x82   : > { %s3885_s11 = scalar_lea.vmem %s345_s22, 1024  ;;  %p3893_p13 = scmp.lt.s32.totalorder %s345_s22, %s345_s22 }
  0x83   : > { %p3886_p7 = scmp.ne.s32.totalorder %s345_s22, %s3885_s11  ;;  %p3894_p1 = scmp.lt.s32.totalorder %s3885_s11, %s3885_s11 }
  0x85   : > { %p3888_p8 = pnand %p3886_p7, %p4122_p0  ;;  %p3895_p6 = por %p3894_p1, %p3893_p13 }
  0x87   : > { %p3889_p11 = pneg %p3888_p8 }
  0x89   : > { %p3896_p9 = pnand %p3895_p6, %p3889_p11 }
  0x8b   : > { %3899 = shalt.err (!%p3896_p9)
}
  0x8c   : > { %3551 = dma.hbm_to_vmem [thread:$0]  (!%p4106_p12), %s4687_s7, 1024, %s345_s22, [#allocation10], %s3979_s19, %s3979_s19, %s3980_s21  }
  0x8d   : > { %p4711_p5 = scmp.ne.s32.totalorder %s4707_s26, 0 }
  0x8e   : > { %p4712_p0 = scmp.eq.s32.totalorder (!%p4711_p5), %s4068_s9, 0 }
  0x8f   : > { %372 = sbr.rel (%p4711_p5) target bundleno = 1046 (0x416), region = 60 }
  0x96   : > { %3945 = dma.done.wait (%p4712_p0), [#allocation4], 512   ;;  %p4713_p10 = pmov %p4712_p0 }
  0x97   : > { %p4714_p2 = pmov %p4712_p0 }
  0x98   : > { %3947 = vsyncadd (%p4713_p10), [#allocation4], 4294966784 }
  0x99   : > { %3949 = dma.done.wait (%p4714_p2), [#allocation7], 4096   ;;  %p4715_p3 = pmov %p4712_p0 }
  0x9a   : > { %p4716_p4 = pmov %p4712_p0 }
  0x9b   : > { %3951 = vsyncadd (%p4715_p3), [#allocation7], 4294963200 }
  0x9c   : > { %3953 = dma.done.wait (%p4716_p4), [#allocation10], 4096   ;;  %p4717_p12 = pmov %p4712_p0 }
  0x9d   : > { %v3612_v1 = vld [vmem:[#allocation6 + $0x40] sm:$0xff]   ;;  %v3614_v3 = vld [vmem:[#allocation6 + $0x48] sm:$0xff]   ;;  %v3617_v6 = vld [vmem:[#allocation6 + $0x50] sm:$0xff]   ;;  %v529_v19 = vlaneseq  ;;  %v3983_v21 = vmov 1966171168   ;;  %v3984_v0 = vmov 0.0  }
  0x9e   : > { %3955 = vsyncadd (%p4717_p12), [#allocation10], 4294963200  ;;  %v3613_v2 = vld [vmem:[#allocation6] sm:$0xff]   ;;  %3307 = vmatprep.subr.bf16.mxu0 %v3612_v1  ;;  %v3616_v5 = vld [vmem:[#allocation6 + $0x8] sm:$0xff]   ;;  %v527_v22 = vunpack.c.l.s4 %v3983_v21  ;;  %p424_p7 = scmp.lt.s32.totalorder %s4068_s9, 3  ;;  %vm3985_vm0 = vmmov 0  }
  0x9f   : > { %3308 = vmatpush3.bf16.msra.mxu0 %v3613_v2  ;;  %v3615_v4 = vld [vmem:[#allocation6 + $0x80] sm:$0xff]   ;;  %v3618_v7 = vld [vmem:[#allocation6 + $0x88] sm:$0xff]   ;;  %v3619_v8 = vld [vmem:[#allocation6 + $0x10] sm:$0xff]   ;;  %v4251_v28 = vshrl.u32 %v529_v19, 7  ;;  %vm1866_vm1 = vcmask 1045504   ;;  %vm2927_vm2 = vcmask 1043456  }
  0xa0   : > { %3309 = vmatprep.subr.bf16.mxu0 %v3614_v3  ;;  %3422 = vmatprep.subr.bf16.mxu1 %v3615_v4  ;;  %v3620_v9 = vld [vmem:[#allocation6 + $0x58] sm:$0xff]   ;;  %v3621_v10 = vld [vmem:[#allocation6 + $0x90] sm:$0xff]   ;;  %v3623_v12 = vld [vmem:[#allocation6 + $0x60] sm:$0xff]   ;;  %v528_v32 = vunpack.c.0.s8 %v527_v22  ;;  %s425_s23 = scalar_select %p424_p7, %s4068_s9, 3  ;;  %vm1969_vm3 = vcmask 130112   ;;  %vm1998_vm4 = vcmask 1041409  }
  0xa1   : > { %3423 = vmatpush3.bf16.msra.mxu1 %v3615_v4  ;;  %v3622_v11 = vld [vmem:[#allocation6 + $0x18] sm:$0xff]   ;;  %v3625_v14 = vld [vmem:[#allocation6 + $0x20] sm:$0xff]   ;;  %v3626_v16 = vld [vmem:[#allocation6 + $0x68] sm:$0xff]   ;;  %s421_s27 = sand.u32 1, %s3966_s16   ;;  %vm2000_vm5 = vcmask 1042434   ;;  %vm2002_vm6 = vcmask 1043459  }
  0xa2   : > { %3424 = vmatprep.subr.bf16.mxu1 %v3618_v7  ;;  %v3624_v13 = vld [vmem:[#allocation6 + $0x98] sm:$0xff]   ;;  %v3627_v15 = vld [vmem:[#allocation6 + $0xa0] sm:$0xff]   ;;  %v3628_v17 = vld [vmem:[#allocation6 + $0x28] sm:$0xff]   ;;  %v4254_v48 = vsub.s32 %v528_v32, %v4251_v28  ;;  %s426_s19 = scalar_lea.vmem %s4681_s1, %s425_s23  ;;  %s3188_s30 = sshll.u32 %s421_s27, 3  ;;  %vm2005_vm7 = vcmask 113664   ;;  %vm3050_vm8 = vcmask 97280  }
  0xa3   : > { %3310 = vmatpush3.bf16.msra.mxu0 %v3616_v5  ;;  %v3630_v18 = vld [vmem:[#allocation6 + $0xa8] sm:$0xff]   ;;  %v3629_v20 = vld [vmem:[#allocation6 + $0x70] sm:$0xff]   ;;  %v3632_v24 = vld [vmem:[#allocation6 + $0x78] sm:$0xff]   ;;  %s423_s12 = scalar_lea.vmem [#allocation12], %s3188_s30  ;;  %s3306_s14 = sshll.u32 %s4068_s9, 7 }
  0xa4   : > { %3311 = vmatprep.subr.bf16.mxu0 %v3617_v6  ;;  %v3631_v23 = vld [vmem:[#allocation6 + $0x30] sm:$0xff]   ;;  %v431_v26 = vld [vmem:[#allocation3] sm:$0xf]  ;;  %v433_v27 = vld [vmem:[#allocation3 + $0x8] sm:$0xf]  ;;  %s3068_s28 = sshll.u32 %s423_s12, 4  ;;  %s4636_s13 = scalar_lea.hbm %s4690_s10, %s3306_s14  ;;  %s4638_s28 = int_to_ptr.vmem [resolvable:$true] %s3068_s28 }
  0xa5   : > { %3425 = vmatpush3.bf16.msra.mxu1 %v3618_v7  ;;  %v3633_v25 = vld [vmem:[#allocation6 + $0xb0] sm:$0xff]   ;;  %v432_v29 = vld [vmem:[#allocation3 + $0x4] sm:$0x7]  ;;  %v440_v31 = vld [vmem:[#allocation3 + $0xc] sm:$0xf]  ;;  %s3054_s9 = scalar_lea.sflag [#allocation5], %s421_s27 }
  0xa6   : > { %3426 = vmatprep.subr.bf16.mxu1 %v3621_v10  ;;  %v439_v30 = vld [vmem:[#allocation3 + $0x4] sm:$0xf]  ;;  %v3634_v33 = vld [vmem:[#allocation6 + $0x38] sm:$0xff]   ;;  %v434_v34 = vld [vmem:[#allocation3 + $0xc] sm:$0x7]  ;;  %v3194_v38 = vcombine.low %v433_v27, %v440_v31  ;;  %v3189_v50 = vcombine.low %v431_v26, %v432_v29  ;;  %s3900_s23 = scalar_lea.vmem %s4638_s28, 128 }
  0xa7   : > { %3312 = vmatpush3.bf16.msra.mxu0 %v3619_v8  ;;  %v443_v35 = vld [vmem:[#allocation3] sm:$0xe]  ;;  %v444_v36 = vld [vmem:[#allocation3 + $0x8] sm:$0xe]  ;;  %v3193_v37 = vcombine.low %v431_v26, %v439_v30  ;;  %v3641_v41 = vld [vmem:[#allocation6 + $0xb8] sm:$0xff]   ;;  %v3190_v55 = vcombine.low %v433_v27, %v434_v34  ;;  %p3901_p8 = scmp.ne.s32.totalorder %s4638_s28, %s3900_s23  ;;  %p4718_p11 = scmp.ne.s32.totalorder %s4704_s24, 0 }
  0xa8   : > { %3313 = vmatprep.subr.bf16.mxu0 %v3620_v9  ;;  %v3197_v39 = vcombine.low %v443_v35, %v439_v30  ;;  %v3198_v40 = vcombine.low %v444_v36, %v440_v31  ;;  %v487_v44 = vshrl.u32 %v3194_v38, 16  ;;  %v489_v45 = vshll.u32 %v3194_v38, 16  ;;  %v4256_v49 = vld [vmem:[#allocation3 + $0x10] sm:$0xf]  ;;  %v441_v53 = vld [vmem:[#allocation3 + $0x14] sm:$0xf] }
  0xa9   : > { %3427 = vmatpush3.bf16.msra.mxu1 %v3621_v10  ;;  %v480_v42 = vshrl.u32 %v3193_v37, 16  ;;  %v482_v43 = vshll.u32 %v3193_v37, 16  ;;  %v445_v54 = vld [vmem:[#allocation3 + $0x10] sm:$0xe]  ;;  %v3195_v60 = vcombine.low %v4256_v49, %v441_v53  ;;  %v4264_v6 = vld [vmem:[#allocation3 + $0x18] sm:$0xf]  ;;  %p3902_p13 = pnand %p3901_p8, %p4718_p11 }
  0xaa   : > { %3428 = vmatprep.subr.bf16.mxu1 %v3624_v13  ;;  %v519_v46 = vrot.slane %v3197_v39, 1  ;;  %v520_v47 = vrot.slane %v3198_v40, 1  ;;  %v491_v52 = vrot.slane %v489_v45, 1  ;;  %v3199_v1 = vcombine.low %v445_v54, %v441_v53  ;;  %v4266_v7 = vld [vmem:[#allocation3 + $0x1c] sm:$0xf]  ;;  %s3988_s26 = smov [#allocation12]  }
  0xab   : > { %3314 = vmatpush3.bf16.msra.mxu0 %v3622_v11  ;;  %v484_v51 = vrot.slane %v482_v43, 1  ;;  %v494_v8 = vshrl.u32 %v3195_v60, 16  ;;  %v496_v9 = vshll.u32 %v3195_v60, 16  ;;  %p3903_p1 = pneg %p3902_p13  ;;  %s3904_s29 = sshll.u32 %s3988_s26, 4  ;;  %s3905_s29 = int_to_ptr.vmem [resolvable:$false] %s3904_s29 }
  0xac   : > { %3315 = vmatprep.subr.bf16.mxu0 %v3623_v12  ;;  %v525_v56 = vcombine.high %v519_v46, %v519_v46  ;;  %v591_v57 = vcombine.high %v520_v47, %v520_v47  ;;  %v492_v59 = vor.u32 %v491_v52, %v487_v44  ;;  %v546_v61 = vrot.slane %v519_v46, %v4254_v48  ;;  %v436_v52 = vld [vmem:[#allocation3 + $0x14] sm:$0x7]  ;;  %p3907_p6 = scmp.lt.s32.totalorder %s4638_s28, %s3905_s29 }
  0xad   : > { %3429 = vmatpush3.bf16.msra.mxu1 %v3624_v13  ;;  %v485_v58 = vor.u32 %v484_v51, %v480_v42  ;;  %v612_v63 = vrot.slane %v520_v47, %v4254_v48  ;;  %v4268_v10 = vrot.slane %v3199_v1, 1 }
  0xae   : > { %3430 = vmatprep.subr.bf16.mxu1 %v3627_v15  ;;  %v553_v62 = vrot.slane %v525_v56, %v4254_v48  ;;  %v3202_v4 = vcombine.low %v433_v27, %v492_v59  ;;  %v619_v5 = vrot.slane %v591_v57, %v4254_v48  ;;  %v590_v11 = vcombine.high %v3190_v55, %v492_v59 }
  0xaf   : > { %3316 = vmatpush3.bf16.msra.mxu0 %v3625_v14  ;;  %v3201_v2 = vcombine.low %v431_v26, %v485_v58  ;;  %v524_v3 = vcombine.high %v3189_v50, %v485_v58 }
  0xb0   : > { %3317 = vmatprep.subr.bf16.mxu0 %v3626_v16  ;;  %v598_v14 = vrot.slane %v3202_v4, %v4254_v48  ;;  %v605_v16 = vrot.slane %v590_v11, %v4254_v48  ;;  %v3191_v11 = vcombine.low %v4256_v49, %v436_v52 }
  0xb1   : > { %3431 = vmatpush3.bf16.msra.mxu1 %v3627_v15  ;;  %v532_v12 = vrot.slane %v3201_v2, %v4254_v48  ;;  %v539_v13 = vrot.slane %v524_v3, %v4254_v48  ;;  %v498_v15 = vrot.slane %v496_v9, 1 }
  0xb2   : > { %3432 = vmatprep.subr.bf16.mxu1 %v3630_v18  ;;  %v621_v26 = vcombine.high %v598_v14, %v612_v63  ;;  %v622_v27 = vcombine.low %v605_v16, %v619_v5  ;;  %v623_v35 = vcombine.high %v605_v16, %v619_v5 }
  0xb3   : > { %3318 = vmatpush3.bf16.msra.mxu0 %v3628_v17  ;;  %v678_v17 = vrot.slane %v4268_v10, %v4254_v48  ;;  %v555_v21 = vcombine.high %v532_v12, %v546_v61  ;;  %v556_v22 = vcombine.low %v539_v13, %v553_v62 }
  0xb4   : > { %3319 = vmatprep.subr.bf16.mxu0 %v3629_v20  ;;  %v554_v20 = vcombine.low %v532_v12, %v546_v61  ;;  %v637_v36 = vrot.slane %v622_v27, %v4254_v48  ;;  %v644_v37 = vrot.slane %v621_v26, %v4254_v48  ;;  %v651_v43 = vrot.slane %v623_v35, %v4254_v48  ;;  %v438_v12 = vld [vmem:[#allocation3 + $0x1c] sm:$0x7]  ;;  %v3642_v26 = vld [vmem:[#allocation8] sm:$0xff]  }
  0xb5   : > { %3433 = vmatpush3.bf16.msra.mxu1 %v3630_v18  ;;  %v4278_v18 = vcombine.low %v4264_v6, %v4266_v7  ;;  %v571_v30 = vrot.slane %v556_v22, %v4254_v48  ;;  %v578_v31 = vrot.slane %v555_v21, %v4254_v48  ;;  %v3192_v35 = vcombine.low %v4264_v6, %v438_v12  ;;  %v3647_v12 = vld [vmem:[#allocation8 + $0x18] sm:$0xff]  }
  0xb6   : > { %3434 = vmatprep.subr.bf16.mxu1 %v3633_v25  ;;  %v564_v29 = vrot.slane %v554_v20, %v4254_v48  ;;  %v653_v44 = vcombine.high %v637_v36, %v637_v36  ;;  %v654_v45 = vcombine.high %v644_v37, %v644_v37 }
  0xb7   : > { %3320 = vmatpush3.bf16.msra.mxu0 %v3631_v23  ;;  %v557_v23 = vcombine.high %v539_v13, %v553_v62  ;;  %v587_v38 = vcombine.high %v571_v30, %v571_v30  ;;  %v501_v60 = vshrl.u32 %v4278_v18, 16 }
  0xb8   : > { %3321 = vmatprep.subr.bf16.mxu0 %v3632_v24  ;;  %v620_v24 = vcombine.low %v598_v14, %v612_v63  ;;  %v842_v39 = vcombine.low %v564_v29, %v578_v31  ;;  %v3206_v40 = vcombine.high %v564_v29, %v578_v31  ;;  %v910_v55 = vcombine.low %v654_v45, %v637_v36 }
  0xb9   : > { %3435 = vmatpush3.bf16.msra.mxu1 %v3633_v25  ;;  %v499_v25 = vor.u32 %v498_v15, %v494_v8  ;;  %v585_v32 = vrot.slane %v557_v23, %v4254_v48  ;;  %v911_v62 = vcombine.low %v651_v43, %v653_v44  ;;  %v503_v15 = vshll.u32 %v4278_v18, 16 }
  0xba   : > { %3436 = vmatprep.subr.bf16.mxu1 %v3641_v41  ;;  %v630_v34 = vrot.slane %v620_v24, %v4254_v48  ;;  %v852_v47 = vrot.slane %v842_v39, %v4254_v48  ;;  %v859_v50 = vrot.slane %v3206_v40, %v4254_v48  ;;  %v926_v1 = vrot.slane %v910_v55, %v4254_v48 }
  0xbb   : > { %3322 = vmatpush3.bf16.msra.mxu0 %v3634_v33  ;;  %v446_v33 = vld [vmem:[#allocation3 + $0x18] sm:$0xe]  ;;  %v3203_v53 = vcombine.low %v4256_v49, %v499_v25  ;;  %v933_v22 = vrot.slane %v911_v62, %v4254_v48  ;;  %v505_v49 = vrot.slane %v503_v15, 1  ;;  %v656_v31 = vcombine.high %v3191_v11, %v499_v25 }
  0xbc   : > { %3446 = vmatprep.subr.bf16.mxu0 %v3984_v0  ;;  %v652_v42 = vcombine.high %v630_v34, %v630_v34  ;;  %v845_v46 = vcombine.low %v587_v38, %v630_v34  ;;  %v3200_v56 = vcombine.low %v446_v33, %v4266_v7  ;;  %v875_v58 = vcombine.high %v852_v47, %v859_v50 }
  0xbd   : > { %3437 = vmatpush3.bf16.msra.mxu1 %v3641_v41  ;;  %v844_v41 = vcombine.low %v571_v30, %v585_v32  ;;  %v874_v59 = vcombine.low %v852_v47, %v859_v50  ;;  %v664_v61 = vrot.slane %v3203_v53, %v4254_v48  ;;  %v657_v18 = vcombine.high %v4268_v10, %v4268_v10  ;;  %v3645_v32 = vld [vmem:[#allocation8 + $0x8] sm:$0xff]   ;;  %v3646_v53 = vld [vmem:[#allocation8 + $0x10] sm:$0xff]  }
  0xbe   : > { %v909_v54 = vcombine.low %v644_v37, %v652_v42  ;;  %v873_v57 = vrot.slane %v845_v46, %v4254_v48  ;;  %v891_v3 = vrot.slane %v875_v58, %v4254_v48  ;;  %v522_v16 = vrot.slane %v3200_v56, 1 }
  0xbf   : > { %v866_v51 = vrot.slane %v844_v41, %v4254_v48  ;;  %v884_v5 = vrot.slane %v874_v59, %v4254_v48  ;;  %v686_v7 = vcombine.low %v664_v61, %v678_v17  ;;  %v687_v8 = vcombine.high %v664_v61, %v678_v17 }
  0xc0   : > { %v919_v63 = vrot.slane %v909_v54, %v4254_v48  ;;  %v506_v33 = vor.u32 %v505_v49, %v501_v60  ;;  %v671_v37 = vrot.slane %v656_v31, %v4254_v48  ;;  %v685_v38 = vrot.slane %v657_v18, %v4254_v48 }
  0xc1   : > { %v877_v2 = vcombine.high %v866_v51, %v873_v57  ;;  %v876_v4 = vcombine.low %v866_v51, %v873_v57  ;;  %v696_v20 = vrot.slane %v686_v7, %v4254_v48  ;;  %v710_v21 = vrot.slane %v687_v8, %v4254_v48 }
  0xc2   : > { %v941_v9 = vcombine.low %v919_v63, %v926_v1  ;;  %v942_v23 = vcombine.high %v919_v63, %v926_v1  ;;  %v723_v39 = vcombine.high %v522_v16, %v522_v16  ;;  %v3204_v10 = vcombine.low %v4264_v6, %v506_v33 }
  0xc3   : > { %v905_v13 = vrot.slane %v877_v2, %v4254_v48  ;;  %v898_v14 = vrot.slane %v876_v4, %v4254_v48  ;;  %v912_v29 = vcombine.low %v696_v20, %v710_v21  ;;  %v3207_v34 = vcombine.high %v696_v20, %v710_v21 }
  0xc4   : > { %v951_v30 = vrot.slane %v941_v9, %v4254_v48  ;;  %v958_v25 = vrot.slane %v942_v23, %v4254_v48  ;;  %v744_v40 = vrot.slane %v522_v16, %v4254_v48  ;;  %v722_v41 = vcombine.high %v3192_v35, %v506_v33 }
  0xc5   : > { %v908_v24 = vcombine.low %v891_v3, %v905_v13  ;;  %v906_v17 = vcombine.low %v884_v5, %v898_v14  ;;  %v907_v27 = vcombine.high %v884_v5, %v898_v14  ;;  %v940_v36 = vrot.slane %v912_v29, %v4254_v48 }
  0xc6   : > { %v688_v44 = vcombine.low %v671_v37, %v685_v38  ;;  %v689_v45 = vcombine.high %v671_v37, %v685_v38  ;;  %v730_v46 = vrot.slane %v3204_v10, %v4254_v48  ;;  %v986_v47 = vrot.slane %v3207_v34, %v4254_v48  ;;  %v3653_v38 = vld [vmem:[#allocation8 + $0x28] sm:$0xff]   ;;  %v3654_v10 = vld [vmem:[#allocation8 + $0x30] sm:$0xff]  }
  0xc7   : > { %1264 = vmatprep.mubr.bf16.mxu0 %v908_v24  ;;  %3438 = vmatprep.mubr.bf16.mxu1 %v907_v27  ;;  %v943_v42 = vcombine.low %v933_v22, %v940_v36  ;;  %v944_v43 = vcombine.high %v933_v22, %v940_v36  ;;  %v737_v50 = vrot.slane %v722_v41, %v4254_v48  ;;  %v3651_v24 = vld [vmem:[#allocation8 + $0x20] sm:$0xff]  }
  0xc8   : > { %1265 = vmatmul.mubr.bf16.vlgmr.msra.gmra.mrb[0].mxu0 %v906_v17  ;;  %v751_v51 = vrot.slane %v723_v39, %v4254_v48  ;;  %v703_v54 = vrot.slane %v688_v44, %v4254_v48  ;;  %v717_v55 = vrot.slane %v689_v45, %v4254_v48  ;;  %v752_v56 = vcombine.low %v730_v46, %v744_v40  ;;  %v3656_v41 = vld [vmem:[#allocation9 + $0x80] sm:$0xff]   ;;  %v3659_v44 = vld [vmem:[#allocation9 + $0x88] sm:$0xff]  }
  0xc9   : > { %3447 = vmatpush3.bf16.msra.mxu0 %v3642_v26  ;;  %v965_v52 = vrot.slane %v943_v42, %v4254_v48  ;;  %v972_v6 = vrot.slane %v944_v43, %v4254_v48  ;;  %v753_v57 = vcombine.high %v730_v46, %v744_v40  ;;  %v3655_v40 = vld [vmem:[#allocation8 + $0x38] sm:$0xff]   ;;  %v3657_v42 = vld [vmem:[#allocation9 + $0x40] sm:$0xff]   ;;  %v3660_v45 = vld [vmem:[#allocation9 + $0x48] sm:$0xff]  }
  0xca   : > { %3448 = vmatprep.subr.bf16.mxu0 %v3984_v0  ;;  %v754_v58 = vcombine.low %v737_v50, %v751_v51  ;;  %v755_v59 = vcombine.high %v737_v50, %v751_v51  ;;  %v719_v63 = vcombine.high %v703_v54, %v703_v54  ;;  %v762_v1 = vrot.slane %v752_v56, %v4254_v48  ;;  %v3658_v43 = vld [vmem:[#allocation9] sm:$0xff]   ;;  %v3661_v46 = vld [vmem:[#allocation9 + $0x8] sm:$0xff]   ;;  %v3662_v50 = vld [vmem:[#allocation9 + $0x90] sm:$0xff]  }
  0xcb   : > { %v974_v60 = vcombine.high %v951_v30, %v965_v52  ;;  %v975_v61 = vcombine.low %v958_v25, %v972_v6  ;;  %v973_v62 = vcombine.low %v951_v30, %v965_v52  ;;  %v776_v2 = vrot.slane %v753_v57, %v4254_v48  ;;  %3368 = vmatprep.subr.bf16.mxu1 %v3657_v42  ;;  %v3664_v51 = vld [vmem:[#allocation9 + $0x10] sm:$0xff]   ;;  %v3666_v52 = vld [vmem:[#allocation9 + $0x58] sm:$0xff]   ;;  %v3670_v56 = vld [vmem:[#allocation9 + $0x20] sm:$0xff]  }
  0xcc   : > { %v977_v3 = vcombine.low %v703_v54, %v717_v55  ;;  %v769_v4 = vrot.slane %v754_v58, %v4254_v48  ;;  %v783_v5 = vrot.slane %v755_v59, %v4254_v48  ;;  %v784_v7 = vcombine.high %v762_v1, %v762_v1  ;;  %v3665_v6 = vld [vmem:[#allocation9 + $0x98] sm:$0xff]   ;;  %v3668_v54 = vld [vmem:[#allocation9 + $0xa0] sm:$0xff]   ;;  %v3671_v57 = vld [vmem:[#allocation9 + $0xa8] sm:$0xff]  }
  0xcd   : > { %3449 = vmatpush3.bf16.msra.mxu0 %v3645_v32  ;;  %3439 = vmatmul.mubr.bf16.vlgmr.msra.gmra.mrb[0].mxu1 %v974_v60  ;;  %v978_v8 = vcombine.low %v719_v63, %v762_v1  ;;  %v786_v13 = vcombine.high %v776_v2, %v776_v2  ;;  %v3669_v55 = vld [vmem:[#allocation9 + $0x60] sm:$0xff]   ;;  %v3672_v58 = vld [vmem:[#allocation9 + $0x68] sm:$0xff]   ;;  %v3674_v60 = vld [vmem:[#allocation9 + $0xb0] sm:$0xff]  }
  0xce   : > { %3450 = vmatprep.subr.bf16.mxu0 %v3984_v0  ;;  %1272 = vmatprep.mubr.bf16.mxu0 %v975_v61  ;;  %v993_v9 = vrot.slane %v977_v3, %v4254_v48  ;;  %v785_v11 = vcombine.high %v769_v4, %v769_v4  ;;  %v979_v14 = vcombine.low %v776_v2, %v784_v7  ;;  %v3673_v59 = vld [vmem:[#allocation9 + $0x28] sm:$0xff]   ;;  %v3675_v61 = vld [vmem:[#allocation9 + $0x70] sm:$0xff]   ;;  %v3677_v63 = vld [vmem:[#allocation9 + $0xb8] sm:$0xff]  }
  0xcf   : > { %v1000_v15 = vrot.slane %v978_v8, %v4254_v48  ;;  %v1043_v21 = vcombine.low %v786_v13, %v769_v4  ;;  %3369 = vmatpush3.bf16.msra.mxu1 %v3658_v43  ;;  %v3678_v1 = vld [vmem:[#allocation9 + $0x78] sm:$0xff]  }
  0xd0   : > { %1273 = vmatmul.mubr.bf16.gmra.mrb[4].mxu0 %v973_v62  ;;  %v1009_v16 = vcombine.high %v986_v47, %v993_v9  ;;  %v1008_v20 = vcombine.low %v986_v47, %v993_v9  ;;  %v1044_v22 = vcombine.low %v783_v5, %v785_v11  ;;  %v1007_v23 = vrot.slane %v979_v14, %v4254_v48  ;;  %v3663_v47 = vld [vmem:[#allocation9 + $0x50] sm:$0xff]   ;;  %v3679_v2 = vld [vmem:[#allocation9 + $0x38] sm:$0xff]  }
  0xd1   : > { %3451 = vmatpush3.bf16.msra.mxu0 %v3646_v53  ;;  %v1051_v17 = vrot.slane %v1043_v21, %v4254_v48  ;;  %3370 = vmatprep.subr.bf16.mxu1 %v3660_v45  ;;  %v3667_v53 = vld [vmem:[#allocation9 + $0x18] sm:$0xff]   ;;  %v3676_v62 = vld [vmem:[#allocation9 + $0x30] sm:$0xff]  }
  0xd2   : > { %3452 = vmatprep.subr.bf16.mxu0 %v3984_v0  ;;  %v1058_v26 = vrot.slane %v1044_v22, %v4254_v48  ;;  %v1011_v27 = vcombine.high %v1000_v15, %v1007_v23  ;;  %v1025_v49 = vrot.slane %v1009_v16, %v4254_v48  ;;  %v1010_v29 = vcombine.low %v1000_v15, %v1007_v23  ;;  %v3205_v9 = vld [vmem:[%s4683_s3] ss:$0 sm:$0xff] }
  0xd3   : > { %v1018_v30 = vrot.slane %v1008_v20, %v4254_v48  ;;  %3371 = vmatpush3.bf16.msra.mxu1 %v3661_v46 }
  0xd4   : > { %v1059_v31 = vcombine.low %v1051_v17, %v1058_v26  ;;  %v1060_v18 = vcombine.high %v1051_v17, %v1058_v26  ;;  %v1039_v32 = vrot.slane %v1011_v27, %v4254_v48  ;;  %v1032_v33 = vrot.slane %v1010_v29, %v4254_v48  ;;  %3372 = vmatprep.subr.bf16.mxu1 %v3663_v47 }
  0xd5   : > { %3453 = vmatpush3.bf16.msra.mxu0 %v3647_v12 }
  0xd6   : > { %3454 = vmatprep.subr.bf16.mxu0 %v3984_v0  ;;  %v1067_v34 = vrot.slane %v1059_v31, %v4254_v48  ;;  %v1042_v35 = vcombine.low %v1025_v49, %v1039_v32  ;;  %v1040_v36 = vcombine.low %v1018_v30, %v1032_v33  ;;  %v1041_v37 = vcombine.high %v1018_v30, %v1032_v33 }
  0xd7   : > { %v1074_v39 = vrot.slane %v1060_v18, %v4254_v48  ;;  %v4355_v48 = vld [vmem:[%s426_s19] sm:$0x1]  ;;  %3373 = vmatpush3.bf16.msra.mxu1 %v3664_v51  ;;  %s3906_s19 = scalar_lea.vmem %s3905_s29, 256 }
  0xd8   : > { %v1075_v25 = vcombine.high %v1067_v34, %v1067_v34  ;;  %1280 = vmatprep.mubr.bf16.mxu0 %v1042_v35  ;;  %3442 = vmatprep.mubr.bf16.mxu1 %v1041_v37  ;;  %p3908_p9 = scmp.lt.s32.totalorder %s3906_s19, %s3900_s23 }
  0xd9   : > { %3455 = vmatpush3.bf16.msra.mxu0 %v3651_v24  ;;  %3374 = vmatprep.subr.bf16.mxu1 %v3666_v52 }
  0xda   : > { %3456 = vmatprep.subr.bf16.mxu0 %v3984_v0  ;;  %1281 = vmatmul.mubr.bf16.gmra.mrb[8].mxu0 %v1040_v36  ;;  %p3909_p5 = por %p3908_p9, %p3907_p6 }
  0xdb   : > { %3443 = vmatmul.mubr.bf16.gmra.mrb[4].mxu1 %v1075_v25  ;;  %1288 = vmatprep.mubr.bf16.mxu0 %v1074_v39 }
  0xdc   : > { %3375 = vmatpush3.bf16.msra.mxu1 %v3667_v53  ;;  %p3910_p0 = pnand %p3909_p5, %p3903_p1 }
  0xdd   : > { %3457 = vmatpush3.bf16.msra.mxu0 %v3653_v38  ;;  %3376 = vmatprep.subr.bf16.mxu1 %v3669_v55 }
  0xde   : > { %3458 = vmatprep.subr.bf16.mxu0 %v3984_v0 }
  0xe0   : > { %3377 = vmatpush3.bf16.msra.mxu1 %v3670_v56 }
  0xe1   : > { %3459 = vmatpush3.bf16.msra.mxu0 %v3654_v10  ;;  %3378 = vmatprep.subr.bf16.mxu1 %v3672_v58  ;;  %v3986_v58 = vmov 1983009808  }
  0xe2   : > { %3460 = vmatprep.subr.bf16.mxu0 %v3984_v0  ;;  %1289 = vmatmul.mubr.bf16.gmra.mrb[12].mxu0 %v1067_v34 }
  0xe3   : > { %3462 = vmatprep.mubr.msk.bf16.mxu0 %vm3985_vm0, %v3984_v0 }
  0xe4   : > { %3379 = vmatpush3.bf16.msra.mxu1 %v3673_v59  ;;  %v1497_v59 = vunpack.c.l.s4 %v3986_v58 }
  0xe5   : > { %3461 = vmatpush3.bf16.msra.mxu0 %v3655_v40  ;;  %3380 = vmatprep.subr.bf16.mxu1 %v3675_v61 }
  0xe6   : > { %3466 = vmatprep.subr.bf16.mxu0 %v3984_v0  ;;  %v1498_v61 = vunpack.c.0.s8 %v1497_v59 }
  0xe8   : > { %3381 = vmatpush3.bf16.msra.mxu1 %v3676_v62  ;;  %v4374_v62 = vld [vmem:[%s4688_s8] ss:$0 sm:$0xff] }
  0xe9   : > { %3382 = vmatprep.subr.bf16.mxu1 %v3678_v1  ;;  %v1472_v1 = vsub.s32 0, %v4251_v28 }
  0xea   : > { %3463 = vmatmul.mubr.bf16.vlgmr.msra.gmra.mrb[16].mxu0 %v4355_v48 }
  0xeb   : > { %3482 = vmatprep.mubr.msk.bf16.mxu0 %vm3985_vm0, %v3984_v0  ;;  %3467 = vmatpush3.bf16.msra.mxu0 %v3656_v41 }
  0xec   : > { %3468 = vmatprep.subr.bf16.mxu0 %v3984_v0  ;;  %3383 = vmatpush3.bf16.msra.mxu1 %v3679_v2  ;;  %v4382_v2 = vcombine.high %v4374_v62, %v4374_v62 }
  0xed   : > { %3494 = vmatprep.subr.bf16.mxu1 %v3984_v0 }
  0xef   : > { %3469 = vmatpush3.bf16.msra.mxu0 %v3659_v44 }
  0xf0   : > { %3470 = vmatprep.subr.bf16.mxu0 %v3984_v0 }
  0xf3   : > { %3471 = vmatpush3.bf16.msra.mxu0 %v3662_v50 }
  0xf4   : > { %3472 = vmatprep.subr.bf16.mxu0 %v3984_v0 }
  0xf7   : > { %3473 = vmatpush3.bf16.msra.mxu0 %v3665_v6 }
  0xf8   : > { %3474 = vmatprep.subr.bf16.mxu0 %v3984_v0 }
  0xfb   : > { %3475 = vmatpush3.bf16.msra.mxu0 %v3668_v54 }
  0xfc   : > { %3476 = vmatprep.subr.bf16.mxu0 %v3984_v0 }
  0xff   : > { %3477 = vmatpush3.bf16.msra.mxu0 %v3671_v57 }
 0x100   : > { %3478 = vmatprep.subr.bf16.mxu0 %v3984_v0 }
 0x103   : > { %3479 = vmatpush3.bf16.msra.mxu0 %v3674_v60 }
 0x104   : > { %3480 = vmatprep.subr.bf16.mxu0 %v3984_v0 }
 0x107   : > { %3481 = vmatpush3.bf16.msra.mxu0 %v3677_v63  ;;  %v4377_v63 = vsub.s32 %v1498_v61, %v4251_v28 }
 0x19b   : > { %v3323_v3 = vpop.f32.mrb[0].mxu0 }
 0x19c   : > { %v3324_v4 = vpop.f32.mrb[1].mxu0 }
 0x19d   : > { %v3325_v5 = vadd.f32 %v3324_v4, %v3323_v3  ;;  %v3326_v7 = vpop.f32.mrb[2].mxu0  ;;  %v4386_v4 = vrot.slane %v4374_v62, %v4377_v63 }
 0x19e   : > { %v3327_v8 = vpop.f32.mrb[3].mxu0 }
 0x19f   : > { %v3328_v11 = vadd.f32 %v3327_v8, %v3326_v7  ;;  %v1267_v12 = vadd.f32 %v3325_v5, %v3205_v9  ;;  %v4392_v7 = vrot.slane %v4382_v2, %v4377_v63 }
 0x1a0   : > { %v3440_v13 = vpop.f32.mrb[0].mxu1 }
 0x1a1   : > { %v1270_v14 = vadd.f32 %v3328_v11, %v3205_v9  ;;  %v1330_v15 = vpop.f32.mrb[1].mxu1 }
 0x1a2   : > { %v1331_v20 = vadd.f32 %v1330_v15, %v1267_v12  ;;  %v3441_v21 = vpop.f32.mrb[2].mxu1 }
 0x1a3   : > { %v3329_v16 = vpop.f32.mrb[4].mxu0  ;;  %v1333_v23 = vpop.f32.mrb[3].mxu1 }
 0x1a4   : > { %v3330_v22 = vpop.f32.mrb[5].mxu0  ;;  %v1334_v26 = vadd.f32 %v1333_v23, %v1270_v14 }
 0x1a5   : > { %v3331_v24 = vadd.f32 %v3330_v22, %v3329_v16  ;;  %v3332_v17 = vpop.f32.mrb[6].mxu0 }
 0x1a6   : > { %v3333_v27 = vpop.f32.mrb[7].mxu0 }
 0x1a7   : > { %v1275_v49 = vadd.f32 %v3331_v24, %v3205_v9  ;;  %v3334_v29 = vadd.f32 %v3333_v27, %v3332_v17  ;;  %v4400_v17 = vcombine.high %v4392_v7, %v4392_v7 }
 0x1a9   : > { %v1339_v30 = vadd.f32 %v3440_v13, %v1275_v49  ;;  %v1278_v31 = vadd.f32 %v3334_v29, %v3205_v9  ;;  %v4396_v13 = vcombine.high %v4386_v4, %v4386_v4 }
 0x1ab   : > { %v1342_v18 = vadd.f32 %v3441_v21, %v1278_v31 }
 0x1ad   : > { %v3335_v32 = vpop.f32.mrb[8].mxu0 }
 0x1ae   : > { %v3444_v33 = vpop.f32.mrb[4].mxu1  ;;  %v3336_v34 = vpop.f32.mrb[9].mxu0 }
 0x1af   : > { %v1346_v35 = vpop.f32.mrb[5].mxu1  ;;  %v3337_v36 = vadd.f32 %v3336_v34, %v3335_v32  ;;  %v3338_v37 = vpop.f32.mrb[10].mxu0 }
 0x1b0   : > { %v3445_v38 = vpop.f32.mrb[6].mxu1  ;;  %v3339_v39 = vpop.f32.mrb[11].mxu0 }
 0x1b1   : > { %v1349_v25 = vpop.f32.mrb[7].mxu1  ;;  %v3340_v10 = vadd.f32 %v3339_v39, %v3338_v37  ;;  %v1283_v40 = vadd.f32 %v3337_v36, %v3205_v9 }
 0x1b3   : > { %v1347_v41 = vadd.f32 %v1346_v35, %v1283_v40  ;;  %v1286_v42 = vadd.f32 %v3340_v10, %v3205_v9 }
 0x1b5   : > { %v1350_v43 = vadd.f32 %v1349_v25, %v1286_v42  ;;  %v3341_v44 = vpop.f32.mrb[12].mxu0 }
 0x1b6   : > { %v3342_v45 = vpop.f32.mrb[13].mxu0 }
 0x1b7   : > { %v3343_v46 = vadd.f32 %v3342_v45, %v3341_v44  ;;  %v3344_v47 = vpop.f32.mrb[14].mxu0 }
 0x1b8   : > { %v3345_v50 = vpop.f32.mrb[15].mxu0 }
 0x1b9   : > { %v1291_v51 = vadd.f32 %v3343_v46, %v3205_v9 }
 0x1bb   : > { %v1355_v52 = vadd.f32 %v3444_v33, %v1291_v51 }
 0x1bd   : > { %v1458_v6 = vpop.f32.mrb[16].mxu0 }
 0x1be   : > { %v3240_v53 = vmul.f32 -1.442695, %v1458_v6  ;;  %v3464_v54 = vpop.f32.mrb[17].mxu0 }
 0x1bf   : > { %v1461_v55 = vpop.f32.mrb[18].mxu0 }
 0x1c0   : > { %3688 = vpow2.f32 %v3240_v53  ;;  %v3465_v56 = vpop.f32.mrb[19].mxu0 }
 0x1ca   : > { %v3689_v57 = vpop.eup %3688 }
 0x1cb   : > { %v1467_v60 = vadd.f32 1.0, %v3689_v57 }
 0x1cd   : > { %3690 = vrcp.f32 %v1467_v60 }
 0x1d7   : > { %v3691_v3 = vpop.eup %3690 }
 0x1d8   : > { %v1473_v5 = vrot.slane %v3691_v3, %v1472_v1 }
 0x1da   : > { %v1480_v8 = vmul.f32 %v1473_v5, %v1355_v52  ;;  %v1475_v9 = vmul.f32 %v1473_v5, %v1334_v26  ;;  %v1476_v11 = vmul.f32 %v1473_v5, %v1339_v30  ;;  %v1474_v12 = vmul.f32 %v1473_v5, %v1331_v20 }
 0x1db   : > { %v1477_v14 = vmul.f32 %v1473_v5, %v1342_v18  ;;  %v1478_v15 = vmul.f32 %v1473_v5, %v1347_v41  ;;  %v1479_v16 = vmul.f32 %v1473_v5, %v1350_v43 }
 0x1dc   : > { %v1487_v21 = vmax.f32 %v1480_v8, 0.0  ;;  %v1482_v22 = vmax.f32 %v1475_v9, 0.0  ;;  %v1483_v23 = vmax.f32 %v1476_v11, 0.0  ;;  %v1481_v24 = vmax.f32 %v1474_v12, 0.0 }
 0x1dd   : > { %v4402_v27 = vmax.f32 %v1477_v14, 0.0  ;;  %v4404_v26 = vmax.f32 %v1478_v15, 0.0  ;;  %v4406_v20 = vmax.f32 %v1479_v16, 0.0 }
 0x1de   : > { %v1597_v49 = vcombine.high %v1487_v21, %v1487_v21  ;;  %v4409_v29 = vrot.slane %v1487_v21, %v4377_v63  ;;  %v1512_v30 = vcombine.high %v1482_v22, %v1482_v22  ;;  %v1519_v31 = vrot.slane %v1482_v22, %v4377_v63 }
 0x1df   : > { %v1529_v18 = vcombine.high %v1483_v23, %v1483_v23  ;;  %v1536_v32 = vrot.slane %v1483_v23, %v4377_v63  ;;  %v1495_v33 = vcombine.high %v1481_v24, %v1481_v24  ;;  %v4414_v34 = vrot.slane %v1481_v24, %v4377_v63 }
 0x1e0   : > { %v1611_v35 = vrot.slane %v1597_v49, %v4377_v63  ;;  %v1612_v36 = vcombine.high %v4409_v29, %v4409_v29  ;;  %v1526_v37 = vrot.slane %v1512_v30, %v4377_v63  ;;  %v1527_v38 = vcombine.high %v1519_v31, %v1519_v31 }
 0x1e1   : > { %v1672_v39 = vmul.f32 %v4386_v4, %v1519_v31  ;;  %v1543_v25 = vrot.slane %v1529_v18, %v4377_v63  ;;  %v1544_v10 = vcombine.high %v1536_v32, %v1536_v32  ;;  %v1676_v40 = vmul.f32 %v4396_v13, %v1536_v32 }
 0x1e2   : > { %v1613_v41 = vcombine.high %v1611_v35, %v1611_v35  ;;  %v1693_v42 = vmul.f32 %v4386_v4, %v1612_v36  ;;  %v1694_v43 = vmul.f32 %v4396_v13, %v1611_v35  ;;  %v2124_v44 = vcombine.low %v1612_v36, %v1611_v35 }
 0x1e3   : > { %v1673_v45 = vmul.f32 %v4396_v13, %v1527_v38  ;;  %v1674_v46 = vmul.f32 %v4392_v7, %v1526_v37  ;;  %v2025_v47 = vcombine.low %v1519_v31, %v1527_v38  ;;  %v2039_v50 = vrot.slane %v1526_v37, %v4377_v63 }
 0x1e4   : > { %v1695_v51 = vmul.f32 %v4392_v7, %v1613_v41  ;;  %v1840_v52 = vcombine.low %v1693_v42, %v1694_v43  ;;  %v2131_v6 = vrot.slane %v2124_v44, %v4377_v63  ;;  %v2138_v53 = vrot.slane %v1613_v41, %v4377_v63 }
 0x1e5   : > { %v1741_v54 = vcombine.low %v1672_v39, %v1673_v45  ;;  %v1755_v55 = vrot.slane %v1674_v46, %v4377_v63  ;;  %v2032_v56 = vrot.slane %v2025_v47, %v4377_v63  ;;  %v1528_v57 = vcombine.high %v1526_v37, %v1526_v37 }
 0x1e6   : > { %v1847_v58 = vrot.slane %v1840_v52, %v4377_v63  ;;  %v1854_v59 = vrot.slane %v1695_v51, %v4377_v63  ;;  %v4435_v60 = vcombine.low %v2131_v6, %v2138_v53  ;;  %v1677_v61 = vmul.f32 %v4392_v7, %v1544_v10 }
 0x1e7   : > { %v1748_v3 = vrot.slane %v1741_v54, %v4377_v63  ;;  %v2040_v5 = vcombine.low %v2032_v56, %v2039_v50  ;;  %v1675_v8 = vmul.f32 %v4386_v4, %v1528_v57  ;;  %v1678_v9 = vmul.f32 %v4400_v17, %v1543_v25 }
 0x1e8   : > { %v1855_v11 = vcombine.low %v1847_v58, %v1854_v59  ;;  %v2041_v12 = vcombine.low %v1528_v57, %v1536_v32  ;;  %v2042_v14 = vcombine.low %v1544_v10, %v1543_v25  ;;  %v1509_v15 = vrot.slane %v1495_v33, %v4377_v63 }
 0x1e9   : > { %v1756_v16 = vcombine.low %v1748_v3, %v1755_v55  ;;  %v1757_v21 = vcombine.low %v1675_v8, %v1676_v40  ;;  %v1758_v22 = vcombine.low %v1677_v61, %v1678_v9  ;;  %v1510_v23 = vcombine.high %v4414_v34, %v4414_v34 }
 0x1ea   : > { %v1882_v24 = vsel %vm1866_vm1, %v1855_v11, 0.0  ;;  %v2049_v49 = vrot.slane %v2041_v12, %v4377_v63  ;;  %v2056_v30 = vrot.slane %v2042_v14, %v4377_v63  ;;  %v1511_v31 = vcombine.high %v1509_v15, %v1509_v15 }
 0x1eb   : > { %1883 = vadd.xlane.f32.xlu1 %v1882_v24  ;;  %v1867_v18 = vsel %vm1866_vm1, %v1756_v16, 0.0  ;;  %v1765_v32 = vrot.slane %v1757_v21, %v4377_v63  ;;  %v1772_v33 = vrot.slane %v1758_v22, %v4377_v63  ;;  %v1668_v35 = vmul.f32 %v4386_v4, %v4414_v34 }
 0x1ec   : > { %1868 = vadd.xlane.f32.xlu0 %v1867_v18  ;;  %v2057_v36 = vcombine.low %v2049_v49, %v2056_v30  ;;  %v1669_v37 = vmul.f32 %v4396_v13, %v1510_v23  ;;  %v1670_v38 = vmul.f32 %v4392_v7, %v1509_v15  ;;  %v1671_v39 = vmul.f32 %v4400_v17, %v1511_v31 }
 0x1ed   : > { %v1773_v10 = vcombine.low %v1765_v32, %v1772_v33  ;;  %v2008_v40 = vcombine.low %v4414_v34, %v1510_v23  ;;  %v2009_v41 = vcombine.low %v1509_v15, %v1511_v31  ;;  %v1545_v42 = vcombine.high %v1543_v25, %v1543_v25 }
 0x1ee   : > { %v1724_v43 = vcombine.low %v1668_v35, %v1669_v37  ;;  %v1725_v44 = vcombine.low %v1670_v38, %v1671_v39  ;;  %v1553_v45 = vrot.slane %v4402_v27, %v4377_v63  ;;  %v1546_v46 = vcombine.high %v4402_v27, %v4402_v27 }
 0x1ef   : > { %1870 = vadd.xlane.f32.xlu1 %v1773_v10  ;;  %v2016_v47 = vrot.slane %v2008_v40, %v4377_v63  ;;  %v2023_v50 = vrot.slane %v2009_v41, %v4377_v63  ;;  %v1679_v51 = vmul.f32 %v4386_v4, %v1545_v42  ;;  %v1570_v34 = vrot.slane %v4404_v26, %v4377_v63 }
 0x1f0   : > { %v1732_v25 = vrot.slane %v1724_v43, %v4377_v63  ;;  %v1739_v52 = vrot.slane %v1725_v44, %v4377_v63  ;;  %v1561_v6 = vcombine.high %v1553_v45, %v1553_v45  ;;  %v1680_v53 = vmul.f32 %v4396_v13, %v1553_v45 }
 0x1f1   : > { %v2024_v54 = vcombine.low %v2016_v47, %v2023_v50  ;;  %v2058_v55 = vcombine.low %v1545_v42, %v1553_v45  ;;  %v1560_v27 = vrot.slane %v1546_v46, %v4377_v63  ;;  %v1578_v56 = vcombine.high %v1570_v34, %v1570_v34 }
 0x1f2   : > { %v1740_v57 = vcombine.low %v1732_v25, %v1739_v52  ;;  %v1681_v58 = vmul.f32 %v4392_v7, %v1561_v6  ;;  %v1774_v59 = vcombine.low %v1679_v51, %v1680_v53  ;;  %v2072_v61 = vrot.slane %v1561_v6, %v4377_v63 }
 0x1f3   : > { %v4471_v3 = vpack.c.bf16 %v2040_v5, %v2024_v54  ;;  %v2065_v8 = vrot.slane %v2058_v55, %v4377_v63  ;;  %v1562_v9 = vcombine.high %v1560_v27, %v1560_v27  ;;  %v1682_v11 = vmul.f32 %v4386_v4, %v1560_v27 }
 0x1f4   : > { %1864 = vadd.xlane.f32.xlu0 %v1740_v57  ;;  %v1781_v12 = vrot.slane %v1774_v59, %v4377_v63  ;;  %v1788_v14 = vrot.slane %v1681_v58, %v4377_v63  ;;  %v1684_v15 = vmul.f32 %v4392_v7, %v1570_v34  ;;  %v1685_v16 = vmul.f32 %v4400_v17, %v1578_v56 }
 0x1f5   : > { %v2073_v21 = vcombine.low %v2065_v8, %v2072_v61  ;;  %v1683_v22 = vmul.f32 %v4396_v13, %v1562_v9  ;;  %v2074_v23 = vcombine.low %v1560_v27, %v1562_v9  ;;  %v2075_v5 = vcombine.low %v1570_v34, %v1578_v56 }
 0x1f6   : > { %v1789_v24 = vcombine.low %v1781_v12, %v1788_v14  ;;  %v1791_v49 = vcombine.low %v1684_v15, %v1685_v16  ;;  %v1563_v30 = vcombine.high %v4404_v26, %v4404_v26  ;;  %v1587_v31 = vrot.slane %v4406_v20, %v4377_v63 }
 0x1f7   : > { %v4484_v18 = vpack.c.bf16 %v2073_v21, %v2057_v36  ;;  %v1790_v32 = vcombine.low %v1682_v11, %v1683_v22  ;;  %v2082_v33 = vrot.slane %v2074_v23, %v4377_v63  ;;  %v2089_v35 = vrot.slane %v2075_v5, %v4377_v63 }
 0x1f8   : > { %v1872_v37 = vsel %vm1866_vm1, %v1789_v24, 0.0  ;;  %v1805_v38 = vrot.slane %v1791_v49, %v4377_v63  ;;  %v1577_v39 = vrot.slane %v1563_v30, %v4377_v63  ;;  %v1688_v10 = vmul.f32 %v4392_v7, %v1587_v31 }
 0x1f9   : > { %1873 = vadd.xlane.f32.xlu1 %v1872_v37  ;;  %v1798_v26 = vrot.slane %v1790_v32, %v4377_v63  ;;  %v2090_v40 = vcombine.low %v2082_v33, %v2089_v35  ;;  %v2105_v36 = vrot.slane %v1587_v31, %v4377_v63  ;;  %v1580_v41 = vcombine.high %v4406_v20, %v4406_v20 }
 0x1fa   : > { %v1579_v42 = vcombine.high %v1577_v39, %v1577_v39  ;;  %v1686_v43 = vmul.f32 %v4386_v4, %v1577_v39  ;;  %v1821_v44 = vrot.slane %v1688_v10, %v4377_v63  ;;  %v1595_v45 = vcombine.high %v1587_v31, %v1587_v31 }
 0x1fb   : > { %v1806_v46 = vcombine.low %v1798_v26, %v1805_v38  ;;  %v1594_v47 = vrot.slane %v1580_v41, %v4377_v63  ;;  %v1692_v50 = vmul.f32 %v4400_v17, %v4409_v29  ;;  %v2184_v51 = vrot.slane %v4471_v3, 1 }
 0x1fc   : > { %v1687_v34 = vmul.f32 %v4396_v13, %v1579_v42  ;;  %v2091_v25 = vcombine.low %v1577_v39, %v1579_v42  ;;  %v1689_v52 = vmul.f32 %v4386_v4, %v1595_v45  ;;  %v2185_v20 = vrot.slane %v4484_v18, 1 }
 0x1fd   : > { %1875 = vadd.xlane.f32.xlu0 %v1806_v46  ;;  %v1596_v6 = vcombine.high %v1594_v47, %v1594_v47  ;;  %v1690_v53 = vmul.f32 %v4396_v13, %v1594_v47  ;;  %v2107_v54 = vcombine.low %v1595_v45, %v1594_v47  ;;  %v2190_v55 = vcombine.high %v2184_v51, %v2184_v51 }
 0x1fe   : > { %v1807_v27 = vcombine.low %v1686_v43, %v1687_v34  ;;  %v2098_v56 = vrot.slane %v2091_v25, %v4377_v63  ;;  %v2211_v17 = vrot.slane %v2184_v51, %v4377_v63  ;;  %v4509_v57 = vrot.slane %v2185_v20, %v4377_v63 }
 0x1ff   : > { %v1691_v58 = vmul.f32 %v4392_v7, %v1596_v6  ;;  %v1823_v59 = vcombine.low %v1689_v52, %v1690_v53  ;;  %v2108_v4 = vcombine.low %v1596_v6, %v4409_v29  ;;  %v2115_v61 = vrot.slane %v2107_v54, %v4377_v63 }
 0x200   : > { %v1814_v8 = vrot.slane %v1807_v27, %v4377_v63  ;;  %v2106_v13 = vcombine.low %v2098_v56, %v2105_v36  ;;  %v2218_v9 = vrot.slane %v2190_v55, %v4377_v63  ;;  %v2396_v11 = vrot.slane %v2211_v17, %v4377_v63 }
 0x201   : > { %v1824_v12 = vcombine.low %v1691_v58, %v1692_v50  ;;  %v1831_v14 = vrot.slane %v1823_v59, %v4377_v63  ;;  %v2122_v15 = vrot.slane %v2108_v4, %v4377_v63  ;;  %v2153_v16 = vshrl.u32 %v4471_v3, 16 }
 0x202   : > { %v1822_v7 = vcombine.low %v1814_v8, %v1821_v44  ;;  %v2150_v21 = vpack.c.bf16 %v2106_v13, %v2090_v40  ;;  %v3253_v29 = vcombine.low %v2218_v9, %v4509_v57  ;;  %v2155_v22 = vshll.u32 %v4471_v3, 16 }
 0x203   : > { %v1838_v23 = vrot.slane %v1824_v12, %v4377_v63  ;;  %v2123_v5 = vcombine.low %v2115_v61, %v2122_v15  ;;  %v2160_v24 = vshrl.u32 %v4484_v18, 16  ;;  %v2162_v49 = vshll.u32 %v4484_v18, 16 }
 0x204   : > { %v1877_v30 = vsel %vm1866_vm1, %v1822_v7, 0.0  ;;  %v2410_v31 = vrot.slane %v3253_v29, %v4377_v63  ;;  %v2157_v32 = vrot.slane %v2155_v22, 1  ;;  %v2167_v33 = vshrl.u32 %v2150_v21, 16 }
 0x205   : > { %1878 = vadd.xlane.f32.xlu1 %v1877_v30  ;;  %v1839_v35 = vcombine.low %v1831_v14, %v1838_v23  ;;  %v2151_v37 = vpack.c.bf16 %v4435_v60, %v2123_v5  ;;  %v2164_v38 = vrot.slane %v2162_v49, 1  ;;  %v2169_v39 = vshll.u32 %v2150_v21, 16  ;;  %v3680_v49 = vld [vmem:[#allocation11] sm:$0xff]  }
 0x206   : > { %v2413_v10 = vcombine.low %v2396_v11, %v2410_v31  ;;  %v2158_v26 = vor.u32 %v2157_v32, %v2153_v16  ;;  %v2186_v40 = vrot.slane %v2150_v21, 1  ;;  %v2224_v36 = vcombine.high %v2185_v20, %v2185_v20 }
 0x207   : > { %1880 = vadd.xlane.f32.xlu0 %v1839_v35  ;;  %v2165_v41 = vor.u32 %v2164_v38, %v2160_v24  ;;  %v2171_v42 = vrot.slane %v2169_v39, 1  ;;  %v2174_v43 = vshrl.u32 %v2151_v37, 16  ;;  %v2176_v44 = vshll.u32 %v2151_v37, 16 }
 0x208   : > { %3483 = vmatmul.mubr.bf16.vlgmr.msra.gmra.mrb[20].mxu0 %v2413_v10  ;;  %v2188_v45 = vcombine.low %v4471_v3, %v2158_v26  ;;  %v2189_v46 = vcombine.high %v4471_v3, %v2158_v26  ;;  %v2252_v47 = vrot.slane %v2224_v36, %v4377_v63  ;;  %v2279_v60 = vrot.slane %v2186_v40, %v4377_v63  ;;  %v3681_v26 = vld [vmem:[#allocation11 + $0x8] sm:$0xff]  }
 0x209   : > { %v2222_v50 = vcombine.low %v4484_v18, %v2165_v41  ;;  %v2172_v51 = vor.u32 %v2171_v42, %v2167_v33  ;;  %v2223_v34 = vcombine.high %v4484_v18, %v2165_v41  ;;  %3486 = vmatprep.mubr.msk.bf16.mxu0 %vm3985_vm0, %v3984_v0  ;;  %v2178_v25 = vrot.slane %v2176_v44, 1 }
 0x20a   : > { %v2197_v52 = vrot.slane %v2188_v45, %v4377_v63  ;;  %v2204_v20 = vrot.slane %v2189_v46, %v4377_v63  ;;  %v2445_v6 = vrot.slane %v2279_v60, %v4377_v63  ;;  %v2187_v3 = vrot.slane %v2151_v37, 1  ;;  %v3682_v46 = vld [vmem:[#allocation11 + $0x10] sm:$0xff]   ;;  %v3683_v60 = vld [vmem:[#allocation11 + $0x18] sm:$0xff]  }
 0x20b   : > { %v2231_v53 = vrot.slane %v2222_v50, %v4377_v63  ;;  %v2238_v54 = vrot.slane %v2223_v34, %v4377_v63  ;;  %v2256_v55 = vcombine.low %v2150_v21, %v2172_v51  ;;  %v2179_v27 = vor.u32 %v2178_v25, %v2174_v43  ;;  %v3684_v50 = vld [vmem:[#allocation11 + $0x20] sm:$0xff]   ;;  %v3687_v34 = vld [vmem:[#allocation11 + $0x38] sm:$0xff]  }
 0x20c   : > { %v2389_v56 = vrot.slane %v2197_v52, %v4377_v63  ;;  %v2257_v18 = vcombine.high %v2150_v21, %v2172_v51  ;;  %v2313_v17 = vrot.slane %v2187_v3, %v4377_v63  ;;  %v2258_v58 = vcombine.high %v2186_v40, %v2186_v40  ;;  %v3686_v51 = vld [vmem:[#allocation11 + $0x30] sm:$0xff]  }
 0x20d   : > { %v3252_v59 = vcombine.low %v2204_v20, %v2231_v53  ;;  %v2254_v4 = vcombine.high %v2231_v53, %v4509_v57  ;;  %v2265_v61 = vrot.slane %v2256_v55, %v4377_v63  ;;  %v2255_v8 = vcombine.low %v2238_v54, %v2252_v47 }
 0x20e   : > { %v2272_v13 = vrot.slane %v2257_v18, %v4377_v63  ;;  %v2290_v9 = vcombine.low %v2151_v37, %v2179_v27  ;;  %v2291_v11 = vcombine.high %v2151_v37, %v2179_v27  ;;  %v2286_v12 = vrot.slane %v2258_v58, %v4377_v63 }
 0x20f   : > { %v2403_v14 = vrot.slane %v3252_v59, %v4377_v63  ;;  %v3254_v15 = vcombine.low %v2254_v4, %v2238_v54  ;;  %v2438_v16 = vrot.slane %v2265_v61, %v4377_v63  ;;  %v3255_v7 = vcombine.high %v4509_v57, %v2255_v8  ;;  %v3251_v54 = vld [vmem:[%s4686_s6] ss:$0 sm:$0xff] }
 0x210   : > { %v2299_v21 = vrot.slane %v2290_v9, %v4377_v63  ;;  %v2306_v29 = vrot.slane %v2291_v11, %v4377_v63  ;;  %v2292_v22 = vcombine.high %v2187_v3, %v2187_v3  ;;  %v3257_v23 = vcombine.low %v2286_v12, %v2313_v17 }
 0x211   : > { %v2411_v5 = vcombine.low %v2389_v56, %v2403_v14  ;;  %v2412_v24 = vcombine.high %v2389_v56, %v2403_v14  ;;  %v2424_v30 = vrot.slane %v3254_v15, %v4377_v63  ;;  %v2431_v31 = vrot.slane %v3255_v7, %v4377_v63 }
 0x212   : > { %v2322_v32 = vcombine.high %v2299_v21, %v2313_v17  ;;  %v3256_v33 = vcombine.low %v2272_v13, %v2299_v21  ;;  %v2320_v35 = vrot.slane %v2292_v22, %v4377_v63  ;;  %v2466_v43 = vrot.slane %v3257_v23, %v4377_v63 }
 0x213   : > { %2669 = vmatprep.mubr.bf16.mxu1 %v2412_v24  ;;  %v2447_v37 = vcombine.high %v2424_v30, %v2438_v16  ;;  %v2448_v57 = vcombine.low %v2431_v31, %v2445_v6  ;;  %v2446_v38 = vcombine.low %v2424_v30, %v2438_v16  ;;  %v3987_v25 = vmov 0  }
 0x214   : > { %2670 = vmatmul.mubr.bf16.vlgmr.msra.gmra.mrb[8].mxu1 %v2411_v5  ;;  %v3258_v39 = vcombine.low %v2322_v32, %v2306_v29  ;;  %v2323_v10 = vcombine.low %v2306_v29, %v2320_v35  ;;  %v2459_v40 = vrot.slane %v3256_v33, %v4377_v63  ;;  %3611 = vset.pattern.permute.xlu0 %v3987_v25 }
 0x215   : > { %3495 = vmatpush3.bf16.msra.mxu1 %v3680_v49  ;;  %2677 = vmatprep.mubr.bf16.mxu1 %v2447_v37 }
 0x216   : > { %3487 = vmatmul.mubr.bf16.gmra.mrb[24].mxu0 %v2448_v57  ;;  %3496 = vmatprep.subr.bf16.mxu1 %v3984_v0  ;;  %v2473_v36 = vrot.slane %v3258_v39, %v4377_v63  ;;  %v3259_v41 = vcombine.high %v2313_v17, %v2323_v10 }
 0x217   : > { %3490 = vmatprep.mubr.msk.bf16.mxu0 %vm3985_vm0, %v3984_v0 }
 0x218   : > { %v2482_v42 = vcombine.high %v2459_v40, %v2473_v36  ;;  %v2480_v44 = vrot.slane %v3259_v41, %v4377_v63  ;;  %v2481_v45 = vcombine.low %v2459_v40, %v2473_v36  ;;  %v3685_v63 = vld [vmem:[#allocation11 + $0x28] sm:$0xff]  }
 0x219   : > { %3497 = vmatpush3.bf16.msra.mxu1 %v3681_v26 }
 0x21a   : > { %3498 = vmatprep.subr.bf16.mxu1 %v3984_v0  ;;  %v2483_v47 = vcombine.low %v2466_v43, %v2480_v44 }
 0x21c   : > { %2678 = vmatmul.mubr.bf16.gmra.mrb[12].mxu1 %v2446_v38 }
 0x21d   : > { %3499 = vmatpush3.bf16.msra.mxu1 %v3682_v46  ;;  %2685 = vmatprep.mubr.bf16.mxu1 %v2482_v42 }
 0x21e   : > { %3491 = vmatmul.mubr.bf16.gmra.mrb[28].mxu0 %v2483_v47  ;;  %3500 = vmatprep.subr.bf16.mxu1 %v3984_v0 }
 0x221   : > { %3501 = vmatpush3.bf16.msra.mxu1 %v3683_v60 }
 0x222   : > { %3502 = vmatprep.subr.bf16.mxu1 %v3984_v0 }
 0x224   : > { %2686 = vmatmul.mubr.bf16.gmra.mrb[16].mxu1 %v2481_v45 }
 0x225   : > { %3503 = vmatpush3.bf16.msra.mxu1 %v3684_v50  ;;  %3510 = vmatprep.mubr.msk.bf16.mxu1 %vm3985_vm0, %v3984_v0 }
 0x226   : > { %3504 = vmatprep.subr.bf16.mxu1 %v3984_v0 }
 0x229   : > { %3505 = vmatpush3.bf16.msra.mxu1 %v3685_v63 }
 0x22a   : > { %3506 = vmatprep.subr.bf16.mxu1 %v3984_v0 }
 0x22d   : > { %3507 = vmatpush3.bf16.msra.mxu1 %v3686_v51 }
 0x22e   : > { %3508 = vmatprep.subr.bf16.mxu1 %v3984_v0 }
 0x231   : > { %3509 = vmatpush3.bf16.msra.mxu1 %v3687_v34 }
 0x234   : > { %3511 = vmatmul.mubr.bf16.vlgmr.msra.gmra.mrb[20].mxu1 %v4355_v48 }
 0x2db   : > { %v2728_v52 = vpop.f32.mrb[20].mxu0 }
 0x2dc   : > { %v3484_v20 = vpop.f32.mrb[21].mxu0 }
 0x2dd   : > { %v2731_v6 = vpop.f32.mrb[22].mxu0 }
 0x2de   : > { %v3485_v3 = vpop.f32.mrb[23].mxu0 }
 0x2e7   : > { %v3384_v53 = vpop.f32.mrb[8].mxu1 }
 0x2e8   : > { %v3385_v55 = vpop.f32.mrb[9].mxu1 }
 0x2e9   : > { %v3386_v27 = vadd.f32 %v3385_v55, %v3384_v53  ;;  %v3387_v56 = vpop.f32.mrb[10].mxu1  ;;  %v2736_v18 = vpop.f32.mrb[24].mxu0 }
 0x2ea   : > { %v3388_v17 = vpop.f32.mrb[11].mxu1  ;;  %v3488_v0 = vpop.f32.mrb[25].mxu0 }
 0x2eb   : > { %v2672_v58 = vadd.f32 %v3386_v27, %v3251_v54  ;;  %v3389_v59 = vadd.f32 %v3388_v17, %v3387_v56  ;;  %v2739_v48 = vpop.f32.mrb[26].mxu0 }
 0x2ec   : > { %v3489_v4 = vpop.f32.mrb[27].mxu0 }
 0x2ed   : > { %v2729_v61 = vadd.f32 %v2728_v52, %v2672_v58  ;;  %v2675_v8 = vadd.f32 %v3389_v59, %v3251_v54 }
 0x2ef   : > { %v2732_v13 = vadd.f32 %v2731_v6, %v2675_v8  ;;  %v3390_v9 = vpop.f32.mrb[12].mxu1 }
 0x2f0   : > { %v3391_v11 = vpop.f32.mrb[13].mxu1 }
 0x2f1   : > { %v3392_v12 = vadd.f32 %v3391_v11, %v3390_v9  ;;  %v3393_v14 = vpop.f32.mrb[14].mxu1  ;;  %v2744_v15 = vpop.f32.mrb[28].mxu0 }
 0x2f2   : > { %v3394_v16 = vpop.f32.mrb[15].mxu1  ;;  %v3492_v7 = vpop.f32.mrb[29].mxu0 }
 0x2f3   : > { %v2680_v21 = vadd.f32 %v3392_v12, %v3251_v54  ;;  %v3395_v29 = vadd.f32 %v3394_v16, %v3393_v14  ;;  %v2747_v22 = vpop.f32.mrb[30].mxu0 }
 0x2f4   : > { %v3493_v23 = vpop.f32.mrb[31].mxu0 }
 0x2f5   : > { %v2737_v5 = vadd.f32 %v2736_v18, %v2680_v21  ;;  %v2683_v24 = vadd.f32 %v3395_v29, %v3251_v54 }
 0x2f7   : > { %v2740_v49 = vadd.f32 %v2739_v48, %v2683_v24  ;;  %v3396_v30 = vpop.f32.mrb[16].mxu1  ;;  %v1869_v24 = vpop.xlane.xlu0 %1868 }
 0x2f8   : > { %v3397_v31 = vpop.f32.mrb[17].mxu1 }
 0x2f9   : > { %v3398_v32 = vadd.f32 %v3397_v31, %v3396_v30  ;;  %v3399_v33 = vpop.f32.mrb[18].mxu1  ;;  %v1884_v30 = vpop.xlane.xlu1 %1883 }
 0x2fa   : > { %v3400_v35 = vpop.f32.mrb[19].mxu1 }
 0x2fb   : > { %v2688_v37 = vadd.f32 %v3398_v32, %v3251_v54  ;;  %v3401_v57 = vadd.f32 %v3400_v35, %v3399_v33 }
 0x2fd   : > { %v2745_v38 = vadd.f32 %v2744_v15, %v2688_v37  ;;  %v2691_v39 = vadd.f32 %v3401_v57, %v3251_v54  ;;  %v1871_v32 = vpop.xlane.xlu1 %1870 }
 0x2ff   : > { %v2748_v10 = vadd.f32 %v2747_v22, %v2691_v39 }
 0x301   : > { %v1874_v37 = vpop.xlane.xlu1 %1873 }
 0x307   : > { %v2849_v26 = vpop.f32.mrb[20].mxu1 }
 0x308   : > { %v3292_v40 = vmul.f32 -1.442695, %v2849_v26  ;;  %v3512_v36 = vpop.f32.mrb[21].mxu1 }
 0x309   : > { %v2852_v41 = vpop.f32.mrb[22].mxu1 }
 0x30a   : > { %3692 = vpow2.f32 %v3292_v40  ;;  %v3513_v42 = vpop.f32.mrb[23].mxu1 }
 0x314   : > { %v3693_v43 = vpop.eup %3692 }
 0x315   : > { %v2858_v44 = vadd.f32 1.0, %v3693_v43 }
 0x317   : > { %3694 = vrcp.f32 %v2858_v44 }
 0x321   : > { %v3695_v45 = vpop.eup %3694 }
 0x322   : > { %v2864_v46 = vrot.slane %v3695_v45, %v1472_v1 }
 0x324   : > { %v2866_v47 = vmul.f32 %v2864_v46, %v2732_v13  ;;  %v2865_v60 = vmul.f32 %v2864_v46, %v2729_v61  ;;  %v2869_v50 = vmul.f32 %v2864_v46, %v2745_v38  ;;  %v2867_v63 = vmul.f32 %v2864_v46, %v2737_v5  ;;  %v3242_v5 = vld [vmem:[#allocation2] ss:$0 sm:$0xff] }
 0x325   : > { %v2868_v51 = vmul.f32 %v2864_v46, %v2740_v49  ;;  %v2870_v34 = vmul.f32 %v2864_v46, %v2748_v10  ;;  %v1865_v49 = vpop.xlane.xlu0 %1864 }
 0x326   : > { %v2872_v25 = vmax.f32 %v2866_v47, 0.0  ;;  %v2871_v52 = vmax.f32 %v2865_v60, 0.0  ;;  %v2875_v20 = vmax.f32 %v2869_v50, 0.0  ;;  %v2873_v6 = vmax.f32 %v2867_v63, 0.0 }
 0x327   : > { %v2874_v54 = vmax.f32 %v2868_v51, 0.0  ;;  %v2876_v56 = vmax.f32 %v2870_v34, 0.0 }
 0x328   : > { %v2899_v3 = vmul.f32 %v4374_v62, %v2872_v25  ;;  %v2883_v53 = vcombine.high %v2871_v52, %v2871_v52  ;;  %v2905_v55 = vmul.f32 %v4374_v62, %v2875_v20  ;;  %v2884_v27 = vcombine.high %v2872_v25, %v2872_v25 }
 0x329   : > { %v2897_v18 = vmul.f32 %v4374_v62, %v2871_v52  ;;  %v2885_v0 = vcombine.high %v2873_v6, %v2873_v6  ;;  %v2901_v59 = vmul.f32 %v2873_v6, %v4382_v2  ;;  %v2886_v4 = vcombine.high %v2874_v54, %v2874_v54 }
 0x32a   : > { %v2928_v1 = vsel %vm2927_vm2, %v2899_v3, 0.0  ;;  %v2898_v17 = vmul.f32 %v2883_v53, %v4382_v2  ;;  %v2900_v58 = vmul.f32 %v4374_v62, %v2884_v27  ;;  %v2887_v61 = vcombine.high %v2875_v20, %v2875_v20 }
 0x32b   : > { %2929 = vadd.xlane.f32.xlu1 %v2928_v1  ;;  %v2938_v8 = vsel %vm2927_vm2, %v2905_v55, 0.0  ;;  %v2902_v9 = vmul.f32 %v4374_v62, %v2885_v0  ;;  %v2888_v11 = vcombine.high %v2876_v56, %v2876_v56  ;;  %v2907_v14 = vmul.f32 %v2876_v56, %v4382_v2 }
 0x32c   : > { %v2917_v48 = vcombine.low %v2897_v18, %v2898_v17  ;;  %v2918_v13 = vcombine.low %v2900_v58, %v2901_v59  ;;  %v2906_v12 = vmul.f32 %v4374_v62, %v2887_v61  ;;  %v2904_v15 = vmul.f32 %v2886_v4, %v4382_v2  ;;  %v1876_v2 = vpop.xlane.xlu0 %1875 }
 0x32d   : > { %v2933_v7 = vsel %vm2927_vm2, %v2902_v9, 0.0  ;;  %v2903_v21 = vmul.f32 %v4374_v62, %v2874_v54  ;;  %v2908_v29 = vmul.f32 %v4374_v62, %v2888_v11  ;;  %v1879_v62 = vpop.xlane.xlu1 %1878 }
 0x32e   : > { %2925 = vadd.xlane.f32.xlu0 %v2917_v48  ;;  %v2920_v16 = vcombine.low %v2906_v12, %v2907_v14 }
 0x32f   : > { %2939 = vadd.xlane.f32.xlu1 %v2938_v8  ;;  %v2919_v22 = vcombine.low %v2903_v21, %v2904_v15  ;;  %v2943_v23 = vsel %vm2927_vm2, %v2908_v29, 0.0 }
 0x330   : > { %v1881_v31 = vpop.xlane.xlu0 %1880 }
 0x332   : > { %2931 = vadd.xlane.f32.xlu0 %v2918_v13  ;;  %v1959_v13 = vand.u32 127, %v529_v19 }
 0x333   : > { %2934 = vadd.xlane.f32.xlu1 %v2933_v7 }
 0x336   : > { %2936 = vadd.xlane.f32.xlu0 %v2919_v22 }
 0x337   : > { %2944 = vadd.xlane.f32.xlu1 %v2943_v23 }
 0x33a   : > { %2941 = vadd.xlane.f32.xlu0 %v2920_v16 }
 0x350   : > { %1891 = vperm.xlu0 %3611, %v3242_v5  }
 0x3b8   : > { %v2930_v38 = vpop.xlane.xlu1 %2929 }
 0x3bb   : > { %v2926_v33 = vpop.xlane.xlu0 %2925 }
 0x3bc   : > { %v2940_v26 = vpop.xlane.xlu1 %2939 }
 0x3bf   : > { %v2932_v35 = vpop.xlane.xlu0 %2931 }
 0x3c0   : > { %v2935_v20 = vpop.xlane.xlu1 %2934 }
 0x3c3   : > { %v2937_v57 = vpop.xlane.xlu0 %2936 }
 0x3c4   : > { %v2945_v12 = vpop.xlane.xlu1 %2944 }
 0x3c7   : > { %v2942_v39 = vpop.xlane.xlu0 %2941 }
 0x3cf   : > { %v1892_v10 = vpop.permute.xlu0 %1891 }
 0x3d0   : > { %v1894_v40 = vadd.f32 %v1892_v10, %v1865_v49  ;;  %v1895_v36 = vadd.f32 %v1892_v10, %v1869_v24  ;;  %v1896_v41 = vadd.f32 %v1892_v10, %v1871_v32  ;;  %v1897_v42 = vadd.f32 %v1892_v10, %v1874_v37 }
 0x3d1   : > { %v1898_v43 = vadd.f32 %v1892_v10, %v1876_v2  ;;  %v1899_v44 = vadd.f32 %v1892_v10, %v1879_v62  ;;  %v1900_v45 = vadd.f32 %v1892_v10, %v1881_v31  ;;  %v1901_v50 = vadd.f32 %v1892_v10, %v1884_v30 }
 0x3d2   : > { %v3243_v46 = vmul.f32 -1.442695, %v1894_v40  ;;  %v3244_v47 = vmul.f32 -1.442695, %v1895_v36  ;;  %v3245_v60 = vmul.f32 -1.442695, %v1896_v41  ;;  %v2946_v34 = vadd.f32 %v2926_v33, %v1892_v10 }
 0x3d3   : > { %v3246_v63 = vmul.f32 -1.442695, %v1897_v42  ;;  %v3247_v51 = vmul.f32 -1.442695, %v1898_v43  ;;  %v3248_v25 = vmul.f32 -1.442695, %v1899_v44  ;;  %v2947_v52 = vadd.f32 %v2930_v38, %v1892_v10 }
 0x3d4   : > { %3696 = vpow2.f32 %v3243_v46  ;;  %v3249_v6 = vmul.f32 -1.442695, %v1900_v45  ;;  %v2948_v3 = vadd.f32 %v2932_v35, %v1892_v10  ;;  %v3250_v53 = vmul.f32 -1.442695, %v1901_v50 }
 0x3d5   : > { %3698 = vpow2.f32 %v3244_v47  ;;  %v2949_v54 = vadd.f32 %v2935_v20, %v1892_v10  ;;  %v2950_v55 = vadd.f32 %v2937_v57, %v1892_v10  ;;  %v3293_v27 = vmul.f32 -1.442695, %v2946_v34 }
 0x3d6   : > { %3700 = vpow2.f32 %v3245_v60  ;;  %v3294_v56 = vmul.f32 -1.442695, %v2947_v52  ;;  %v3295_v1 = vmul.f32 -1.442695, %v2948_v3  ;;  %v2951_v9 = vadd.f32 %v2940_v26, %v1892_v10 }
 0x3d7   : > { %3702 = vpow2.f32 %v3246_v63  ;;  %v3296_v18 = vmul.f32 -1.442695, %v2949_v54  ;;  %v3297_v17 = vmul.f32 -1.442695, %v2950_v55  ;;  %v2952_v15 = vadd.f32 %v2942_v39, %v1892_v10 }
 0x3d8   : > { %3704 = vpow2.f32 %v3247_v51  ;;  %v2953_v21 = vadd.f32 %v2945_v12, %v1892_v10  ;;  %v1964_v24 = vadd.s32 4294967288, %v1959_v13  ;;  %v3298_v49 = vmul.f32 -1.442695, %v2951_v9 }
 0x3d9   : > { %3706 = vpow2.f32 %v3248_v25  ;;  %v3299_v30 = vmul.f32 -1.442695, %v2952_v15  ;;  %v4594_v35 = vsub.s32 %v1959_v13, %v4251_v28 }
 0x3da   : > { %3708 = vpow2.f32 %v3249_v6  ;;  %v3300_v32 = vmul.f32 -1.442695, %v2953_v21  ;;  %v4597_v62 = vsub.s32 %v1964_v24, %v4251_v28 }
 0x3db   : > { %3710 = vpow2.f32 %v3250_v53 }
 0x3dc   : > { %3712 = vpow2.f32 %v3293_v27 }
 0x3dd   : > { %3714 = vpow2.f32 %v3294_v56 }
 0x3de   : > { %v3697_v0 = vpop.eup %3696  ;;  %3716 = vpow2.f32 %v3295_v1 }
 0x3df   : > { %v3699_v58 = vpop.eup %3698  ;;  %v1926_v59 = vadd.f32 1.0, %v3697_v0  ;;  %3718 = vpow2.f32 %v3296_v18 }
 0x3e0   : > { %v3701_v48 = vpop.eup %3700  ;;  %v1927_v4 = vadd.f32 1.0, %v3699_v58  ;;  %3720 = vpow2.f32 %v3297_v17 }
 0x3e1   : > { %v3703_v61 = vpop.eup %3702  ;;  %v1928_v8 = vadd.f32 1.0, %v3701_v48  ;;  %3722 = vrcp.f32 %v1926_v59 }
 0x3e2   : > { %v3705_v11 = vpop.eup %3704  ;;  %v1929_v14 = vadd.f32 1.0, %v3703_v61  ;;  %3724 = vrcp.f32 %v1927_v4 }
 0x3e3   : > { %v3707_v16 = vpop.eup %3706  ;;  %v1930_v7 = vadd.f32 1.0, %v3705_v11  ;;  %3726 = vrcp.f32 %v1928_v8 }
 0x3e4   : > { %v3709_v29 = vpop.eup %3708  ;;  %v1931_v22 = vadd.f32 1.0, %v3707_v16  ;;  %3728 = vrcp.f32 %v1929_v14 }
 0x3e5   : > { %v3711_v23 = vpop.eup %3710  ;;  %v1932_v5 = vadd.f32 1.0, %v3709_v29  ;;  %3730 = vrcp.f32 %v1930_v7 }
 0x3e6   : > { %v3713_v2 = vpop.eup %3712  ;;  %v1933_v19 = vadd.f32 1.0, %v3711_v23  ;;  %3732 = vrcp.f32 %v1931_v22 }
 0x3e7   : > { %v3715_v31 = vpop.eup %3714  ;;  %3734 = vrcp.f32 %v1932_v5  ;;  %v2978_v37 = vadd.f32 1.0, %v3713_v2 }
 0x3e8   : > { %v3717_v33 = vpop.eup %3716  ;;  %3736 = vrcp.f32 %v1933_v19  ;;  %v2979_v38 = vadd.f32 1.0, %v3715_v31 }
 0x3e9   : > { %v3719_v57 = vpop.eup %3718  ;;  %3738 = vpow2.f32 %v3298_v49  ;;  %v2980_v10 = vadd.f32 1.0, %v3717_v33 }
 0x3ea   : > { %v3721_v39 = vpop.eup %3720  ;;  %3740 = vpow2.f32 %v3299_v30  ;;  %v2981_v40 = vadd.f32 1.0, %v3719_v57 }
 0x3eb   : > { %v3723_v26 = vpop.eup %3722  ;;  %3742 = vpow2.f32 %v3300_v32  ;;  %v2982_v45 = vadd.f32 1.0, %v3721_v39 }
 0x3ec   : > { %v3725_v36 = vpop.eup %3724  ;;  %v1963_v41 = vrot.slane %v3723_v26, %v4594_v35  ;;  %3744 = vrcp.f32 %v2978_v37 }
 0x3ed   : > { %v3727_v42 = vpop.eup %3726  ;;  %v1968_v43 = vrot.slane %v3725_v36, %v4597_v62  ;;  %3746 = vrcp.f32 %v2979_v38 }
 0x3ee   : > { %v3729_v28 = vpop.eup %3728  ;;  %v1974_v44 = vrot.slane %v3727_v42, %v4594_v35  ;;  %3748 = vrcp.f32 %v2980_v10 }
 0x3ef   : > { %v3731_v46 = vpop.eup %3730  ;;  %v1970_v47 = vsel %vm1969_vm3, %v1968_v43, %v1963_v41  ;;  %v1978_v60 = vrot.slane %v3729_v28, %v4597_v62  ;;  %3750 = vrcp.f32 %v2981_v40 }
 0x3f0   : > { %v3733_v50 = vpop.eup %3732  ;;  %v1983_v63 = vrot.slane %v3731_v46, %v4594_v35  ;;  %3752 = vrcp.f32 %v2982_v45 }
 0x3f1   : > { %v3735_v51 = vpop.eup %3734  ;;  %v1979_v34 = vsel %vm1969_vm3, %v1978_v60, %v1974_v44  ;;  %v1987_v25 = vrot.slane %v3733_v50, %v4597_v62 }
 0x3f2   : > { %v3737_v52 = vpop.eup %3736  ;;  %v1992_v20 = vrot.slane %v3735_v51, %v4594_v35  ;;  %v1999_v6 = vsel %vm1998_vm4, %v1979_v34, %v1970_v47 }
 0x3f3   : > { %v3739_v3 = vpop.eup %3738  ;;  %v1988_v53 = vsel %vm1969_vm3, %v1987_v25, %v1983_v63  ;;  %v1996_v54 = vrot.slane %v3737_v52, %v4597_v62 }
 0x3f4   : > { %v3741_v55 = vpop.eup %3740  ;;  %v2001_v27 = vsel %vm2000_vm5, %v1988_v53, %v1999_v6  ;;  %v2983_v56 = vadd.f32 1.0, %v3739_v3 }
 0x3f5   : > { %v3743_v1 = vpop.eup %3742  ;;  %v1997_v18 = vsel %vm1969_vm3, %v1996_v54, %v1992_v20  ;;  %v2984_v17 = vadd.f32 1.0, %v3741_v55 }
 0x3f6   : > { %v3745_v0 = vpop.eup %3744  ;;  %v2003_v58 = vsel %vm2002_vm6, %v1997_v18, %v2001_v27  ;;  %v2985_v59 = vadd.f32 1.0, %v3743_v1  ;;  %3754 = vrcp.f32 %v2983_v56 }
 0x3f7   : > { %v3747_v48 = vpop.eup %3746  ;;  %v2006_v4 = vsel %vm2005_vm7, %v2003_v58, 0.0  ;;  %3756 = vrcp.f32 %v2984_v17  ;;  %v3013_v13 = vrot.slane %v3745_v0, %v4594_v35 }
 0x3f8   : > { %v3749_v61 = vpop.eup %3748  ;;  %2007 = vst [vmem:[%s423_s12] sm:$0xf] %v2006_v4  ;;  %3758 = vrcp.f32 %v2985_v59  ;;  %v3017_v9 = vrot.slane %v3747_v48, %v4597_v62 }
 0x3f9   : > { %v3751_v8 = vpop.eup %3750  ;;  %v3022_v11 = vrot.slane %v3749_v61, %v4594_v35 }
 0x3fa   : > { %v3026_v12 = vrot.slane %v3751_v8, %v4597_v62  ;;  %v3753_v14 = vpop.eup %3752  ;;  %v3018_v15 = vsel %vm1969_vm3, %v3017_v9, %v3013_v13 }
 0x3fb   : > { %v3031_v7 = vrot.slane %v3753_v14, %v4594_v35 }
 0x3fc   : > { %v3027_v16 = vsel %vm1969_vm3, %v3026_v12, %v3022_v11 }
 0x3fd   : > { %v3046_v23 = vsel %vm1998_vm4, %v3027_v16, %v3018_v15 }
 0x400   : > { %v3755_v21 = vpop.eup %3754 }
 0x401   : > { %v3757_v29 = vpop.eup %3756  ;;  %v3035_v22 = vrot.slane %v3755_v21, %v4597_v62 }
 0x402   : > { %v3759_v5 = vpop.eup %3758  ;;  %v3040_v24 = vrot.slane %v3757_v29, %v4594_v35 }
 0x403   : > { %v3036_v49 = vsel %vm1969_vm3, %v3035_v22, %v3031_v7  ;;  %v3044_v2 = vrot.slane %v3759_v5, %v4597_v62 }
 0x404   : > { %v3047_v19 = vsel %vm2000_vm5, %v3036_v49, %v3046_v23 }
 0x405   : > { %v3045_v30 = vsel %vm1969_vm3, %v3044_v2, %v3040_v24 }
 0x406   : > { %v3048_v31 = vsel %vm2002_vm6, %v3045_v30, %v3047_v19 }
 0x407   : > { %v3051_v32 = vsel %vm3050_vm8, %v3048_v31, 0.0 }
 0x408   : > { %3052 = vst [vmem:[%s423_s12 + $0x4] sm:$0xf] %v3051_v32 }
 0x409   : > { %3913 = shalt.err (!%p3910_p0)
}
 0x40a   : > { %s3914_s21 = scalar_lea.hbm %s4636_s13, 128  ;;  %s3918_s15 = scalar_lea.hbm %s4690_s10, 512 }
 0x40b   : > { %p3915_p10 = scmp.ne.s32.totalorder %s4636_s13, %s3914_s21  ;;  %p3919_p4 = scmp.lt.u32.totalorder %s4636_s13, %s4690_s10 }
 0x40c   : > { %p3920_p12 = scmp.lt.u32.totalorder %s3918_s15, %s3914_s21  ;;  %p3922_p8 = scmp.lt.u32.totalorder %s3914_s21, %s4636_s13 }
 0x40d   : > { %p3916_p2 = pnand %p3915_p10, %p4718_p11 }
 0x40e   : > { %p3921_p7 = por %p3920_p12, %p3919_p4 }
 0x40f   : > { %p3917_p3 = pneg %p3916_p2 }
 0x410   : > { %p3923_p13 = por %p3922_p8, %p3921_p7 }
 0x412   : > { %p3924_p1 = pnand %p3923_p13, %p3917_p3 }
 0x414   : > { %3927 = shalt.err (!%p3924_p1)
}
 0x415   : > { %3534 = dma.vmem_to_hbm [thread:$0]  (%p4718_p11), %s4638_s28, 128, %s4636_s13, %s3054_s9  }
 0x416 PF: > { %s4719_s27 = sld [smem:[#allocation17_spill]]  ;;  %s4720_s30 = sld [smem:[#allocation21_spill]] }
 0x417   : > { %p3566_p6 = scmp.ge.s32.totalorder %s3974_s18, 2 }
 0x41c   : > { %s3080_s12 = sand.u32 1, %s4719_s27   ;;  %p4721_p9 = scmp.ne.s32.totalorder %s4720_s30, 0 }
 0x41d   : > { %s3081_s14 = scalar_lea.sflag [#allocation5], %s3080_s12 }
 0x41e   : > { %p3553_p5 = pnand %p3566_p6, %p4721_p9 }
 0x420   : > { %3957 = dma.done.wait (!%p3553_p5), %s3081_s14, 128  }
 0x421   : > { %3959 = vsyncadd (!%p3553_p5), %s3081_s14, 4294967168  ;;  %s4722_s18 = sld [smem:[#allocation19_spill]]  ;;  %s4723_s11 = sld [smem:[#allocation18_spill]] }
 0x422   : > { %s4724_s17 = sld [smem:[#allocation20_spill]]  ;;  %s4725_s15 = smov %s3966_s16 }
 0x427   : > { %p25_p0 = scmp.ge.s32.totalorder %s4722_s18, 6   ;;  %s4726_s16 = smov %s4723_s11 }
 0x429   :  { %27 = sbr.rel (!%p25_p0) target bundleno = 9 (0x9), region = 116 }
 0x430   :  { %3086 = vsyncpa [#allocation4], 1 }
 0x431   :  { %3088 = vsyncpa [#allocation4 + $0x1], 1 }
 0x432   :  { %3089 = vsyncpa [#allocation7], 1 }
 0x433   :  { %3090 = vsyncpa [#allocation10], 1 }
 0x434   :  { %3091 = vsyncpa [#allocation5], 1 }
 0x435   :  { %3093 = vsyncpa [#allocation5 + $0x1], 1 }

</bundles_post_ra>
